<compile_context>
chip_gen: v5e
topology: v5e:2x2
jax: 0.10.0
libtpu: 0.0.40
codegen_flags: <defaults>
</compile_context>

<pallas_src>
import math

import jax
import jax.numpy as jnp
from jax.experimental import pallas as pl
from jax.experimental.pallas import tpu as pltpu

# ----------------------------- model config (small, consistent with module) ---
INPUT_DIM = 20
D_MODEL = 32
NHEAD = 4
HEAD_DIM = D_MODEL // NHEAD
NUM_LAYERS = 2
DIM_FF = 64
OUTPUT_DIM = 16
BATCH = 2
SEQ = 8
LN_EPS = 1e-5

SLAB_W = 64  # slab column width (>= widest parameter matrix: DIM_FF)

_VMEM = pl.BlockSpec(memory_space=pltpu.MemorySpace.VMEM)


# ----------------------- static parameter-slab layout --------------------------
def _build_layout():
    bs = BATCH * SEQ
    layout = {}
    row = [0]

    def add(name, nr, nc):
        layout[name] = (row[0], nr, nc)
        row[0] += ((nr + 7) // 8) * 8          # keep every entry 8-row aligned

    add("w_in", INPUT_DIM, D_MODEL)
    add("pe_bin", bs, D_MODEL)                  # positional encoding + b_in
    add("attn_mask", bs, bs)                    # block-diagonal additive mask
    for l in range(NUM_LAYERS):
        add(f"w_qkv_hm_{l}", NHEAD * D_MODEL, 3 * HEAD_DIM)   # head-major QKV
        add(f"b_qkv_bc_{l}", NHEAD * bs, 3 * HEAD_DIM)        # bias, pre-broadcast
        add(f"w_o_{l}", D_MODEL, D_MODEL)
        add(f"b_o_{l}", 1, D_MODEL)
        add(f"w1_{l}", D_MODEL, DIM_FF)
        add(f"b1_{l}", 1, DIM_FF)
        add(f"w2_{l}", DIM_FF, D_MODEL)
        add(f"b2_{l}", 1, D_MODEL)
        add(f"g1_{l}", 1, D_MODEL)
        add(f"be1_{l}", 1, D_MODEL)
        add(f"g2_{l}", 1, D_MODEL)
        add(f"be2_{l}", 1, D_MODEL)
    add("w_out", D_MODEL, OUTPUT_DIM)
    add("b_out", 1, OUTPUT_DIM)
    return layout, row[0]


LAYOUT, SLAB_ROWS = _build_layout()


# --------------------------------- fused Pallas kernel ------------------------
def fused_forward_kernel(x_ref, slab_ref, o_ref):
    def p(name):
        r0, nr, nc = LAYOUT[name]
        return slab_ref[r0:r0 + nr, 0:nc]

    def mm(a, w):                       # (r,k) @ (k,n) -> (r,n), f32 MXU
        return jax.lax.dot_general(a, w, (((1,), (0,)), ((), ())),
                                   preferred_element_type=jnp.float32)

    def bmm(a, w):                      # batch dim 0: (B,r,k) @ (B,k,n) -> (B,r,n)
        return jax.lax.dot_general(a, w, (((2,), (1,)), ((0,), (0,))),
                                   preferred_element_type=jnp.float32)

    def layernorm(z, gamma, beta):
        mean = jnp.mean(z, axis=-1, keepdims=True)
        var = jnp.mean(jnp.square(z - mean), axis=-1, keepdims=True)
        return (z - mean) * jax.lax.rsqrt(var + LN_EPS) * gamma + beta

    bs = BATCH * SEQ
    scale = 1.0 / math.sqrt(HEAD_DIM)

    # ---- input mapping + positional encoding (b_in pre-added into pe rows) ----
    h = mm(x_ref[...], p("w_in")) + p("pe_bin")                 # (bs, D)
    mask = p("attn_mask")                                       # (bs, bs)

    # TODO(synk): src_key_padding_mask not implemented (module default is None).
    for l in range(NUM_LAYERS):
        # ------------- multi-head self-attention, batched over heads ----------
        w_qkv = p(f"w_qkv_hm_{l}").reshape(NHEAD, D_MODEL, 3 * HEAD_DIM)
        b_qkv = p(f"b_qkv_bc_{l}").reshape(NHEAD, bs, 3 * HEAD_DIM)
        h_b = jnp.broadcast_to(h, (NHEAD, bs, D_MODEL))
        qkv = bmm(h_b, w_qkv) + b_qkv                           # (H, bs, 3*hd)
        q = qkv[:, :, 0:HEAD_DIM]
        k = qkv[:, :, HEAD_DIM:2 * HEAD_DIM]
        v = qkv[:, :, 2 * HEAD_DIM:3 * HEAD_DIM]

        # scores: one batched dot (contract head_dim, no transpose)
        s = jax.lax.dot_general(q, k, (((2,), (2,)), ((0,), (0,))),
                                preferred_element_type=jnp.float32) * scale
        s = s + mask                       # block-diagonal per-utterance attention
        s = s - jnp.max(s, axis=-1, keepdims=True)
        e = jnp.exp(s)
        probs = e * pl.reciprocal(jnp.sum(e, axis=-1, keepdims=True), approx=True)

        # context: one batched dot
        ctx = jax.lax.dot_general(probs, v, (((2,), (1,)), ((0,), (0,))),
                                  preferred_element_type=jnp.float32)  # (H, bs, hd)

        # head-major output projection (sum over heads), no scratch round trip
        w_o = p(f"w_o_{l}").reshape(NHEAD, HEAD_DIM, D_MODEL)
        attn = jnp.sum(bmm(ctx, w_o), axis=0) + p(f"b_o_{l}")   # (bs, D)
        h = layernorm(h + attn, p(f"g1_{l}"), p(f"be1_{l}"))

        # ------------------------- feed-forward block --------------------------
        ff = jnp.maximum(mm(h, p(f"w1_{l}")) + p(f"b1_{l}"), 0.0)
        ff = mm(ff, p(f"w2_{l}")) + p(f"b2_{l}")
        h = layernorm(h + ff, p(f"g2_{l}"), p(f"be2_{l}"))

    # ------------------------------ output mapping -----------------------------
    o_ref[...] = mm(h, p("w_out")) + p("b_out")


# --------------------------------- forward wrapper -----------------------------
def _cost_estimate():
    bs = BATCH * SEQ
    flops = 2 * bs * INPUT_DIM * D_MODEL
    for _ in range(NUM_LAYERS):
        flops += 2 * bs * D_MODEL * 3 * D_MODEL            # qkv projection
        flops += 2 * NHEAD * bs * bs * HEAD_DIM * 2        # scores + probs@v
        flops += 2 * bs * D_MODEL * D_MODEL                # output projection
        flops += 2 * bs * D_MODEL * DIM_FF * 2             # ffn
    flops += 2 * bs * D_MODEL * OUTPUT_DIM
    transcendentals = NUM_LAYERS * NHEAD * bs * bs         # exp in softmax
    bytes_accessed = 4 * (bs * INPUT_DIM + SLAB_ROWS * SLAB_W + bs * OUTPUT_DIM)
    return pl.CostEstimate(flops=flops, transcendentals=transcendentals,
                           bytes_accessed=bytes_accessed)


def transformer_forward(x, params):
    # x: (B, S, input_dim), batch_first=True like the PyTorch module.
    b, s, _ = x.shape
    assert (b, s) == (BATCH, SEQ)
    x2d = x.reshape(b * s, INPUT_DIM)

    out2d = pl.pallas_call(
        fused_forward_kernel,
        out_shape=jax.ShapeDtypeStruct((b * s, OUTPUT_DIM), jnp.float32),
        in_specs=[_VMEM, _VMEM],          # 2 DMAs: activations + packed params
        out_specs=_VMEM,
        cost_estimate=_cost_estimate(),
    )(x2d, params["slab"])
    return out2d.reshape(b, s, OUTPUT_DIM)


# --------------------------------- parameters ---------------------------------
def make_positional_encoding(max_len, d_model):
    position = jnp.arange(max_len, dtype=jnp.float32)[:, None]
    div_term = jnp.exp(
        jnp.arange(0, d_model, 2, dtype=jnp.float32) * (-math.log(10000.0) / d_model)
    )
    pe = jnp.zeros((max_len, d_model), jnp.float32)
    pe = pe.at[:, 0::2].set(jnp.sin(position * div_term))
    pe = pe.at[:, 1::2].set(jnp.cos(position * div_term))
    return pe


def init_params(key):
    keys = iter(jax.random.split(key, 4 + NUM_LAYERS * 8))
    bs = BATCH * SEQ

    def xavier(k, fan_in, fan_out):
        bound = math.sqrt(6.0 / (fan_in + fan_out))
        return jax.random.uniform(k, (fan_in, fan_out), jnp.float32, -bound, bound)

    def bias(k, fan_in, n):
        bound = 1.0 / math.sqrt(fan_in)
        return jax.random.uniform(k, (1, n), jnp.float32, -bound, bound)

    entries = {}
    w_in = xavier(next(keys), INPUT_DIM, D_MODEL)
    b_in = bias(next(keys), INPUT_DIM, D_MODEL)
    w_out = xavier(next(keys), D_MODEL, OUTPUT_DIM)
    b_out = bias(next(keys), D_MODEL, OUTPUT_DIM)

    entries["w_in"] = w_in
    # positional encoding pre-tiled over batch with the input bias pre-added
    pe = make_positional_encoding(SEQ, D_MODEL)
    entries["pe_bin"] = jnp.tile(pe, (BATCH, 1)) + b_in          # (bs, D)

    # block-diagonal attention mask: rows of different utterances never attend
    row_b = jnp.arange(bs) // SEQ
    entries["attn_mask"] = jnp.where(
        row_b[:, None] == row_b[None, :], 0.0, -1e9).astype(jnp.float32)

    for l in range(NUM_LAYERS):
        w_qkv = xavier(next(keys), D_MODEL, 3 * D_MODEL)
        b_qkv = bias(next(keys), D_MODEL, 3 * D_MODEL)
        w_o = xavier(next(keys), D_MODEL, D_MODEL)
        b_o = bias(next(keys), D_MODEL, D_MODEL)
        w1 = xavier(next(keys), D_MODEL, DIM_FF)
        b1 = bias(next(keys), D_MODEL, DIM_FF)
        w2 = xavier(next(keys), DIM_FF, D_MODEL)
        b2 = bias(next(keys), DIM_FF, D_MODEL)

        # head-major re-pack of the QKV projection: head h's 24 output columns
        # are [q_h | k_h | v_h]; stacked so the head axis is a leading dim.
        wq, wk, wv = (w_qkv[:, 0:D_MODEL], w_qkv[:, D_MODEL:2 * D_MODEL],
                      w_qkv[:, 2 * D_MODEL:3 * D_MODEL])
        bq, bk, bv = (b_qkv[:, 0:D_MODEL], b_qkv[:, D_MODEL:2 * D_MODEL],
                      b_qkv[:, 2 * D_MODEL:3 * D_MODEL])
        w_hm, b_bc = [], []
        for hh in range(NHEAD):
            c = slice(hh * HEAD_DIM, (hh + 1) * HEAD_DIM)
            w_hm.append(jnp.concatenate([wq[:, c], wk[:, c], wv[:, c]], axis=1))
            bias_h = jnp.concatenate([bq[:, c], bk[:, c], bv[:, c]], axis=1)
            b_bc.append(jnp.tile(bias_h, (bs, 1)))               # (bs, 24)
        entries[f"w_qkv_hm_{l}"] = jnp.concatenate(w_hm, axis=0)  # (H*D, 24)
        entries[f"b_qkv_bc_{l}"] = jnp.concatenate(b_bc, axis=0)  # (H*bs, 24)

        # output projection rows are already head-contiguous -> store as-is
        entries[f"w_o_{l}"] = w_o
        entries[f"b_o_{l}"] = b_o
        entries[f"w1_{l}"] = w1
        entries[f"b1_{l}"] = b1
        entries[f"w2_{l}"] = w2
        entries[f"b2_{l}"] = b2
        entries[f"g1_{l}"] = jnp.ones((1, D_MODEL), jnp.float32)
        entries[f"be1_{l}"] = jnp.zeros((1, D_MODEL), jnp.float32)
        entries[f"g2_{l}"] = jnp.ones((1, D_MODEL), jnp.float32)
        entries[f"be2_{l}"] = jnp.zeros((1, D_MODEL), jnp.float32)

    entries["w_out"] = w_out
    entries["b_out"] = b_out

    # pack everything into one f32 slab (single parameter DMA at kernel entry)
    slab = jnp.zeros((SLAB_ROWS, SLAB_W), jnp.float32)
    for name, (r0, nr, nc) in LAYOUT.items():
        arr = entries[name]
        assert arr.shape == (nr, nc), (name, arr.shape, (nr, nc))
        slab = slab.at[r0:r0 + nr, 0:nc].set(arr)
    return {"slab": slab}


# ------------------------------------- main -------------------------------------
if __name__ == "__main__":
    key = jax.random.PRNGKey(0)
    pkey, xkey = jax.random.split(key)
    params = init_params(pkey)
    x = jax.random.normal(xkey, (BATCH, SEQ, INPUT_DIM), jnp.float32)

    fwd = jax.jit(lambda inp: transformer_forward(inp, params))
    out = fwd(x)
    jax.block_until_ready(out)

    assert out.shape == (BATCH, SEQ, OUTPUT_DIM)
    assert bool(jnp.all(jnp.isfinite(out)))
    print("KERNEL_OK")
</pallas_src>

<mosaic_0001>
module attributes {stable_mosaic.version = 11 : i64} {
  func.func @fused_forward_kernel(%arg0: memref<16x20xf32, #tpu.memory_space<vmem>>, %arg1: memref<848x64xf32, #tpu.memory_space<vmem>>, %arg2: memref<16x16xf32, #tpu.memory_space<vmem>>) attributes {dimension_semantics = [], scalar_prefetch = 0 : i64, scratch_operands = 0 : i64, tpu.core_type = #tpu.core_type<tc>} {
    %c0 = arith.constant 0 : index
    %c0_0 = arith.constant 0 : index
    %0 = vector.load %arg0[%c0, %c0_0] : memref<16x20xf32, #tpu.memory_space<vmem>>, vector<16x20xf32>
    %c0_1 = arith.constant 0 : index
    %c0_2 = arith.constant 0 : index
    %1 = vector.load %arg1[%c0_1, %c0_2] : memref<848x64xf32, #tpu.memory_space<vmem>>, vector<20x32xf32>
    %cst = arith.constant dense<0.000000e+00> : vector<16x32xf32>
    %2 = tpu.matmul %0, %1, %cst {dimension_numbers = #tpu.dot_dimension_numbers<[1], [0], [0], [1], [0, 0, 1, 1], [], []>} : vector<16x20xf32>, vector<20x32xf32>, vector<16x32xf32> -> vector<16x32xf32>
    %c24 = arith.constant 24 : index
    %c0_3 = arith.constant 0 : index
    %3 = vector.load %arg1[%c24, %c0_3] : memref<848x64xf32, #tpu.memory_space<vmem>>, vector<16x32xf32>
    %4 = arith.addf %2, %3 : vector<16x32xf32>
    %c40 = arith.constant 40 : index
    %c0_4 = arith.constant 0 : index
    %5 = vector.load %arg1[%c40, %c0_4] : memref<848x64xf32, #tpu.memory_space<vmem>>, vector<16x16xf32>
    %c56 = arith.constant 56 : index
    %c0_5 = arith.constant 0 : index
    %6 = vector.load %arg1[%c56, %c0_5] : memref<848x64xf32, #tpu.memory_space<vmem>>, vector<128x24xf32>
    %7 = vector.shape_cast %6 : vector<128x24xf32> to vector<4x32x24xf32>
    %c184 = arith.constant 184 : index
    %c0_6 = arith.constant 0 : index
    %8 = vector.load %arg1[%c184, %c0_6] : memref<848x64xf32, #tpu.memory_space<vmem>>, vector<64x24xf32>
    %9 = vector.shape_cast %8 : vector<64x24xf32> to vector<4x16x24xf32>
    %10 = vector.shape_cast %4 : vector<16x32xf32> to vector<1x16x32xf32>
    %11 = vector.broadcast %10 : vector<1x16x32xf32> to vector<4x16x32xf32>
    %cst_7 = arith.constant dense<0.000000e+00> : vector<4x16x24xf32>
    %12 = tpu.matmul %11, %7, %cst_7 {dimension_numbers = #tpu.dot_dimension_numbers<[2], [1], [1], [2], [0, 0, 0, 1, 1, 2], [0], [0]>} : vector<4x16x32xf32>, vector<4x32x24xf32>, vector<4x16x24xf32> -> vector<4x16x24xf32>
    %13 = arith.addf %12, %9 : vector<4x16x24xf32>
    %14 = vector.extract_strided_slice %13 {offsets = [0, 0, 0], sizes = [4, 16, 8], strides = [1, 1, 1]} : vector<4x16x24xf32> to vector<4x16x8xf32>
    %15 = vector.extract_strided_slice %13 {offsets = [0, 0, 8], sizes = [4, 16, 8], strides = [1, 1, 1]} : vector<4x16x24xf32> to vector<4x16x8xf32>
    %16 = vector.extract_strided_slice %13 {offsets = [0, 0, 16], sizes = [4, 16, 8], strides = [1, 1, 1]} : vector<4x16x24xf32> to vector<4x16x8xf32>
    %cst_8 = arith.constant dense<0.000000e+00> : vector<4x16x16xf32>
    %17 = tpu.matmul %14, %15, %cst_8 {dimension_numbers = #tpu.dot_dimension_numbers<[2], [2], [1], [1], [0, 0, 0, 1, 1, 1], [0], [0]>} : vector<4x16x8xf32>, vector<4x16x8xf32>, vector<4x16x16xf32> -> vector<4x16x16xf32>
    %cst_9 = arith.constant 0.353553385 : f32
    %18 = vector.broadcast %cst_9 : f32 to vector<4x16x16xf32>
    %19 = arith.mulf %17, %18 : vector<4x16x16xf32>
    %20 = vector.shape_cast %5 : vector<16x16xf32> to vector<1x16x16xf32>
    %21 = vector.broadcast %20 : vector<1x16x16xf32> to vector<4x16x16xf32>
    %22 = arith.addf %19, %21 : vector<4x16x16xf32>
    %cst_10 = arith.constant dense<0xFF800000> : vector<4x16xf32>
    %23 = vector.multi_reduction <maximumf>, %22, %cst_10 [2] : vector<4x16x16xf32> to vector<4x16xf32>
    %24 = vector.shape_cast %23 : vector<4x16xf32> to vector<4x16x1xf32>
    %25 = vector.broadcast %24 : vector<4x16x1xf32> to vector<4x16x16xf32>
    %26 = arith.subf %22, %25 : vector<4x16x16xf32>
    %27 = math.exp %26 : vector<4x16x16xf32>
    %cst_11 = arith.constant dense<0.000000e+00> : vector<4x16xf32>
    %28 = vector.multi_reduction <add>, %27, %cst_11 [2] : vector<4x16x16xf32> to vector<4x16xf32>
    %29 = vector.shape_cast %28 : vector<4x16xf32> to vector<4x16x1xf32>
    %30 = tpu.reciprocal %29 {approx = true} : vector<4x16x1xf32> -> vector<4x16x1xf32>
    %31 = vector.broadcast %30 : vector<4x16x1xf32> to vector<4x16x16xf32>
    %32 = arith.mulf %27, %31 : vector<4x16x16xf32>
    %cst_12 = arith.constant dense<0.000000e+00> : vector<4x16x8xf32>
    %33 = tpu.matmul %32, %16, %cst_12 {dimension_numbers = #tpu.dot_dimension_numbers<[2], [1], [1], [2], [0, 0, 0, 1, 1, 2], [0], [0]>} : vector<4x16x16xf32>, vector<4x16x8xf32>, vector<4x16x8xf32> -> vector<4x16x8xf32>
    %c248 = arith.constant 248 : index
    %c0_13 = arith.constant 0 : index
    %34 = vector.load %arg1[%c248, %c0_13] : memref<848x64xf32, #tpu.memory_space<vmem>>, vector<32x32xf32>
    %35 = vector.shape_cast %34 : vector<32x32xf32> to vector<4x8x32xf32>
    %cst_14 = arith.constant dense<0.000000e+00> : vector<4x16x32xf32>
    %36 = tpu.matmul %33, %35, %cst_14 {dimension_numbers = #tpu.dot_dimension_numbers<[2], [1], [1], [2], [0, 0, 0, 1, 1, 2], [0], [0]>} : vector<4x16x8xf32>, vector<4x8x32xf32>, vector<4x16x32xf32> -> vector<4x16x32xf32>
    %cst_15 = arith.constant dense<0.000000e+00> : vector<16x32xf32>
    %37 = vector.multi_reduction <add>, %36, %cst_15 [0] : vector<4x16x32xf32> to vector<16x32xf32>
    %c280 = arith.constant 280 : index
    %c0_16 = arith.constant 0 : index
    %38 = vector.load %arg1[%c280, %c0_16] : memref<848x64xf32, #tpu.memory_space<vmem>>, vector<1x32xf32>
    %39 = vector.broadcast %38 : vector<1x32xf32> to vector<16x32xf32>
    %40 = arith.addf %37, %39 : vector<16x32xf32>
    %41 = arith.addf %4, %40 : vector<16x32xf32>
    %c400 = arith.constant 400 : index
    %c0_17 = arith.constant 0 : index
    %42 = vector.load %arg1[%c400, %c0_17] : memref<848x64xf32, #tpu.memory_space<vmem>>, vector<1x32xf32>
    %c408 = arith.constant 408 : index
    %c0_18 = arith.constant 0 : index
    %43 = vector.load %arg1[%c408, %c0_18] : memref<848x64xf32, #tpu.memory_space<vmem>>, vector<1x32xf32>
    %cst_19 = arith.constant dense<0.000000e+00> : vector<16xf32>
    %44 = vector.multi_reduction <add>, %41, %cst_19 [1] : vector<16x32xf32> to vector<16xf32>
    %45 = vector.shape_cast %44 : vector<16xf32> to vector<16x1xf32>
    %cst_20 = arith.constant 3.200000e+01 : f32
    %46 = vector.broadcast %cst_20 : f32 to vector<16x1xf32>
    %47 = arith.divf %45, %46 : vector<16x1xf32>
    %48 = vector.broadcast %47 : vector<16x1xf32> to vector<16x32xf32>
    %49 = arith.subf %41, %48 : vector<16x32xf32>
    %50 = arith.mulf %49, %49 : vector<16x32xf32>
    %cst_21 = arith.constant dense<0.000000e+00> : vector<16xf32>
    %51 = vector.multi_reduction <add>, %50, %cst_21 [1] : vector<16x32xf32> to vector<16xf32>
    %52 = vector.shape_cast %51 : vector<16xf32> to vector<16x1xf32>
    %cst_22 = arith.constant 3.200000e+01 : f32
    %53 = vector.broadcast %cst_22 : f32 to vector<16x1xf32>
    %54 = arith.divf %52, %53 : vector<16x1xf32>
    %55 = vector.broadcast %47 : vector<16x1xf32> to vector<16x32xf32>
    %56 = arith.subf %41, %55 : vector<16x32xf32>
    %cst_23 = arith.constant 9.99999974E-6 : f32
    %57 = vector.broadcast %cst_23 : f32 to vector<16x1xf32>
    %58 = arith.addf %54, %57 : vector<16x1xf32>
    %59 = math.rsqrt %58 : vector<16x1xf32>
    %60 = vector.broadcast %59 : vector<16x1xf32> to vector<16x32xf32>
    %61 = arith.mulf %56, %60 : vector<16x32xf32>
    %62 = vector.broadcast %42 : vector<1x32xf32> to vector<16x32xf32>
    %63 = arith.mulf %61, %62 : vector<16x32xf32>
    %64 = vector.broadcast %43 : vector<1x32xf32> to vector<16x32xf32>
    %65 = arith.addf %63, %64 : vector<16x32xf32>
    %c288 = arith.constant 288 : index
    %c0_24 = arith.constant 0 : index
    %66 = vector.load %arg1[%c288, %c0_24] : memref<848x64xf32, #tpu.memory_space<vmem>>, vector<32x64xf32>
    %cst_25 = arith.constant dense<0.000000e+00> : vector<16x64xf32>
    %67 = tpu.matmul %65, %66, %cst_25 {dimension_numbers = #tpu.dot_dimension_numbers<[1], [0], [0], [1], [0, 0, 1, 1], [], []>} : vector<16x32xf32>, vector<32x64xf32>, vector<16x64xf32> -> vector<16x64xf32>
    %c320 = arith.constant 320 : index
    %c0_26 = arith.constant 0 : index
    %68 = vector.load %arg1[%c320, %c0_26] : memref<848x64xf32, #tpu.memory_space<vmem>>, vector<1x64xf32>
    %69 = vector.broadcast %68 : vector<1x64xf32> to vector<16x64xf32>
    %70 = arith.addf %67, %69 : vector<16x64xf32>
    %cst_27 = arith.constant 0.000000e+00 : f32
    %71 = vector.broadcast %cst_27 : f32 to vector<16x64xf32>
    %72 = arith.maximumf %70, %71 : vector<16x64xf32>
    %c328 = arith.constant 328 : index
    %c0_28 = arith.constant 0 : index
    %73 = vector.load %arg1[%c328, %c0_28] : memref<848x64xf32, #tpu.memory_space<vmem>>, vector<64x32xf32>
    %cst_29 = arith.constant dense<0.000000e+00> : vector<16x32xf32>
    %74 = tpu.matmul %72, %73, %cst_29 {dimension_numbers = #tpu.dot_dimension_numbers<[1], [0], [0], [1], [0, 0, 1, 1], [], []>} : vector<16x64xf32>, vector<64x32xf32>, vector<16x32xf32> -> vector<16x32xf32>
    %c392 = arith.constant 392 : index
    %c0_30 = arith.constant 0 : index
    %75 = vector.load %arg1[%c392, %c0_30] : memref<848x64xf32, #tpu.memory_space<vmem>>, vector<1x32xf32>
    %76 = vector.broadcast %75 : vector<1x32xf32> to vector<16x32xf32>
    %77 = arith.addf %74, %76 : vector<16x32xf32>
    %78 = arith.addf %65, %77 : vector<16x32xf32>
    %c416 = arith.constant 416 : index
    %c0_31 = arith.constant 0 : index
    %79 = vector.load %arg1[%c416, %c0_31] : memref<848x64xf32, #tpu.memory_space<vmem>>, vector<1x32xf32>
    %c424 = arith.constant 424 : index
    %c0_32 = arith.constant 0 : index
    %80 = vector.load %arg1[%c424, %c0_32] : memref<848x64xf32, #tpu.memory_space<vmem>>, vector<1x32xf32>
    %cst_33 = arith.constant dense<0.000000e+00> : vector<16xf32>
    %81 = vector.multi_reduction <add>, %78, %cst_33 [1] : vector<16x32xf32> to vector<16xf32>
    %82 = vector.shape_cast %81 : vector<16xf32> to vector<16x1xf32>
    %cst_34 = arith.constant 3.200000e+01 : f32
    %83 = vector.broadcast %cst_34 : f32 to vector<16x1xf32>
    %84 = arith.divf %82, %83 : vector<16x1xf32>
    %85 = vector.broadcast %84 : vector<16x1xf32> to vector<16x32xf32>
    %86 = arith.subf %78, %85 : vector<16x32xf32>
    %87 = arith.mulf %86, %86 : vector<16x32xf32>
    %cst_35 = arith.constant dense<0.000000e+00> : vector<16xf32>
    %88 = vector.multi_reduction <add>, %87, %cst_35 [1] : vector<16x32xf32> to vector<16xf32>
    %89 = vector.shape_cast %88 : vector<16xf32> to vector<16x1xf32>
    %cst_36 = arith.constant 3.200000e+01 : f32
    %90 = vector.broadcast %cst_36 : f32 to vector<16x1xf32>
    %91 = arith.divf %89, %90 : vector<16x1xf32>
    %92 = vector.broadcast %84 : vector<16x1xf32> to vector<16x32xf32>
    %93 = arith.subf %78, %92 : vector<16x32xf32>
    %cst_37 = arith.constant 9.99999974E-6 : f32
    %94 = vector.broadcast %cst_37 : f32 to vector<16x1xf32>
    %95 = arith.addf %91, %94 : vector<16x1xf32>
    %96 = math.rsqrt %95 : vector<16x1xf32>
    %97 = vector.broadcast %96 : vector<16x1xf32> to vector<16x32xf32>
    %98 = arith.mulf %93, %97 : vector<16x32xf32>
    %99 = vector.broadcast %79 : vector<1x32xf32> to vector<16x32xf32>
    %100 = arith.mulf %98, %99 : vector<16x32xf32>
    %101 = vector.broadcast %80 : vector<1x32xf32> to vector<16x32xf32>
    %102 = arith.addf %100, %101 : vector<16x32xf32>
    %c432 = arith.constant 432 : index
    %c0_38 = arith.constant 0 : index
    %103 = vector.load %arg1[%c432, %c0_38] : memref<848x64xf32, #tpu.memory_space<vmem>>, vector<128x24xf32>
    %104 = vector.shape_cast %103 : vector<128x24xf32> to vector<4x32x24xf32>
    %c560 = arith.constant 560 : index
    %c0_39 = arith.constant 0 : index
    %105 = vector.load %arg1[%c560, %c0_39] : memref<848x64xf32, #tpu.memory_space<vmem>>, vector<64x24xf32>
    %106 = vector.shape_cast %105 : vector<64x24xf32> to vector<4x16x24xf32>
    %107 = vector.shape_cast %102 : vector<16x32xf32> to vector<1x16x32xf32>
    %108 = vector.broadcast %107 : vector<1x16x32xf32> to vector<4x16x32xf32>
    %cst_40 = arith.constant dense<0.000000e+00> : vector<4x16x24xf32>
    %109 = tpu.matmul %108, %104, %cst_40 {dimension_numbers = #tpu.dot_dimension_numbers<[2], [1], [1], [2], [0, 0, 0, 1, 1, 2], [0], [0]>} : vector<4x16x32xf32>, vector<4x32x24xf32>, vector<4x16x24xf32> -> vector<4x16x24xf32>
    %110 = arith.addf %109, %106 : vector<4x16x24xf32>
    %111 = vector.extract_strided_slice %110 {offsets = [0, 0, 0], sizes = [4, 16, 8], strides = [1, 1, 1]} : vector<4x16x24xf32> to vector<4x16x8xf32>
    %112 = vector.extract_strided_slice %110 {offsets = [0, 0, 8], sizes = [4, 16, 8], strides = [1, 1, 1]} : vector<4x16x24xf32> to vector<4x16x8xf32>
    %113 = vector.extract_strided_slice %110 {offsets = [0, 0, 16], sizes = [4, 16, 8], strides = [1, 1, 1]} : vector<4x16x24xf32> to vector<4x16x8xf32>
    %cst_41 = arith.constant dense<0.000000e+00> : vector<4x16x16xf32>
    %114 = tpu.matmul %111, %112, %cst_41 {dimension_numbers = #tpu.dot_dimension_numbers<[2], [2], [1], [1], [0, 0, 0, 1, 1, 1], [0], [0]>} : vector<4x16x8xf32>, vector<4x16x8xf32>, vector<4x16x16xf32> -> vector<4x16x16xf32>
    %cst_42 = arith.constant 0.353553385 : f32
    %115 = vector.broadcast %cst_42 : f32 to vector<4x16x16xf32>
    %116 = arith.mulf %114, %115 : vector<4x16x16xf32>
    %117 = vector.shape_cast %5 : vector<16x16xf32> to vector<1x16x16xf32>
    %118 = vector.broadcast %117 : vector<1x16x16xf32> to vector<4x16x16xf32>
    %119 = arith.addf %116, %118 : vector<4x16x16xf32>
    %cst_43 = arith.constant dense<0xFF800000> : vector<4x16xf32>
    %120 = vector.multi_reduction <maximumf>, %119, %cst_43 [2] : vector<4x16x16xf32> to vector<4x16xf32>
    %121 = vector.shape_cast %120 : vector<4x16xf32> to vector<4x16x1xf32>
    %122 = vector.broadcast %121 : vector<4x16x1xf32> to vector<4x16x16xf32>
    %123 = arith.subf %119, %122 : vector<4x16x16xf32>
    %124 = math.exp %123 : vector<4x16x16xf32>
    %cst_44 = arith.constant dense<0.000000e+00> : vector<4x16xf32>
    %125 = vector.multi_reduction <add>, %124, %cst_44 [2] : vector<4x16x16xf32> to vector<4x16xf32>
    %126 = vector.shape_cast %125 : vector<4x16xf32> to vector<4x16x1xf32>
    %127 = tpu.reciprocal %126 {approx = true} : vector<4x16x1xf32> -> vector<4x16x1xf32>
    %128 = vector.broadcast %127 : vector<4x16x1xf32> to vector<4x16x16xf32>
    %129 = arith.mulf %124, %128 : vector<4x16x16xf32>
    %cst_45 = arith.constant dense<0.000000e+00> : vector<4x16x8xf32>
    %130 = tpu.matmul %129, %113, %cst_45 {dimension_numbers = #tpu.dot_dimension_numbers<[2], [1], [1], [2], [0, 0, 0, 1, 1, 2], [0], [0]>} : vector<4x16x16xf32>, vector<4x16x8xf32>, vector<4x16x8xf32> -> vector<4x16x8xf32>
    %c624 = arith.constant 624 : index
    %c0_46 = arith.constant 0 : index
    %131 = vector.load %arg1[%c624, %c0_46] : memref<848x64xf32, #tpu.memory_space<vmem>>, vector<32x32xf32>
    %132 = vector.shape_cast %131 : vector<32x32xf32> to vector<4x8x32xf32>
    %cst_47 = arith.constant dense<0.000000e+00> : vector<4x16x32xf32>
    %133 = tpu.matmul %130, %132, %cst_47 {dimension_numbers = #tpu.dot_dimension_numbers<[2], [1], [1], [2], [0, 0, 0, 1, 1, 2], [0], [0]>} : vector<4x16x8xf32>, vector<4x8x32xf32>, vector<4x16x32xf32> -> vector<4x16x32xf32>
    %cst_48 = arith.constant dense<0.000000e+00> : vector<16x32xf32>
    %134 = vector.multi_reduction <add>, %133, %cst_48 [0] : vector<4x16x32xf32> to vector<16x32xf32>
    %c656 = arith.constant 656 : index
    %c0_49 = arith.constant 0 : index
    %135 = vector.load %arg1[%c656, %c0_49] : memref<848x64xf32, #tpu.memory_space<vmem>>, vector<1x32xf32>
    %136 = vector.broadcast %135 : vector<1x32xf32> to vector<16x32xf32>
    %137 = arith.addf %134, %136 : vector<16x32xf32>
    %138 = arith.addf %102, %137 : vector<16x32xf32>
    %c776 = arith.constant 776 : index
    %c0_50 = arith.constant 0 : index
    %139 = vector.load %arg1[%c776, %c0_50] : memref<848x64xf32, #tpu.memory_space<vmem>>, vector<1x32xf32>
    %c784 = arith.constant 784 : index
    %c0_51 = arith.constant 0 : index
    %140 = vector.load %arg1[%c784, %c0_51] : memref<848x64xf32, #tpu.memory_space<vmem>>, vector<1x32xf32>
    %cst_52 = arith.constant dense<0.000000e+00> : vector<16xf32>
    %141 = vector.multi_reduction <add>, %138, %cst_52 [1] : vector<16x32xf32> to vector<16xf32>
    %142 = vector.shape_cast %141 : vector<16xf32> to vector<16x1xf32>
    %cst_53 = arith.constant 3.200000e+01 : f32
    %143 = vector.broadcast %cst_53 : f32 to vector<16x1xf32>
    %144 = arith.divf %142, %143 : vector<16x1xf32>
    %145 = vector.broadcast %144 : vector<16x1xf32> to vector<16x32xf32>
    %146 = arith.subf %138, %145 : vector<16x32xf32>
    %147 = arith.mulf %146, %146 : vector<16x32xf32>
    %cst_54 = arith.constant dense<0.000000e+00> : vector<16xf32>
    %148 = vector.multi_reduction <add>, %147, %cst_54 [1] : vector<16x32xf32> to vector<16xf32>
    %149 = vector.shape_cast %148 : vector<16xf32> to vector<16x1xf32>
    %cst_55 = arith.constant 3.200000e+01 : f32
    %150 = vector.broadcast %cst_55 : f32 to vector<16x1xf32>
    %151 = arith.divf %149, %150 : vector<16x1xf32>
    %152 = vector.broadcast %144 : vector<16x1xf32> to vector<16x32xf32>
    %153 = arith.subf %138, %152 : vector<16x32xf32>
    %cst_56 = arith.constant 9.99999974E-6 : f32
    %154 = vector.broadcast %cst_56 : f32 to vector<16x1xf32>
    %155 = arith.addf %151, %154 : vector<16x1xf32>
    %156 = math.rsqrt %155 : vector<16x1xf32>
    %157 = vector.broadcast %156 : vector<16x1xf32> to vector<16x32xf32>
    %158 = arith.mulf %153, %157 : vector<16x32xf32>
    %159 = vector.broadcast %139 : vector<1x32xf32> to vector<16x32xf32>
    %160 = arith.mulf %158, %159 : vector<16x32xf32>
    %161 = vector.broadcast %140 : vector<1x32xf32> to vector<16x32xf32>
    %162 = arith.addf %160, %161 : vector<16x32xf32>
    %c664 = arith.constant 664 : index
    %c0_57 = arith.constant 0 : index
    %163 = vector.load %arg1[%c664, %c0_57] : memref<848x64xf32, #tpu.memory_space<vmem>>, vector<32x64xf32>
    %cst_58 = arith.constant dense<0.000000e+00> : vector<16x64xf32>
    %164 = tpu.matmul %162, %163, %cst_58 {dimension_numbers = #tpu.dot_dimension_numbers<[1], [0], [0], [1], [0, 0, 1, 1], [], []>} : vector<16x32xf32>, vector<32x64xf32>, vector<16x64xf32> -> vector<16x64xf32>
    %c696 = arith.constant 696 : index
    %c0_59 = arith.constant 0 : index
    %165 = vector.load %arg1[%c696, %c0_59] : memref<848x64xf32, #tpu.memory_space<vmem>>, vector<1x64xf32>
    %166 = vector.broadcast %165 : vector<1x64xf32> to vector<16x64xf32>
    %167 = arith.addf %164, %166 : vector<16x64xf32>
    %cst_60 = arith.constant 0.000000e+00 : f32
    %168 = vector.broadcast %cst_60 : f32 to vector<16x64xf32>
    %169 = arith.maximumf %167, %168 : vector<16x64xf32>
    %c704 = arith.constant 704 : index
    %c0_61 = arith.constant 0 : index
    %170 = vector.load %arg1[%c704, %c0_61] : memref<848x64xf32, #tpu.memory_space<vmem>>, vector<64x32xf32>
    %cst_62 = arith.constant dense<0.000000e+00> : vector<16x32xf32>
    %171 = tpu.matmul %169, %170, %cst_62 {dimension_numbers = #tpu.dot_dimension_numbers<[1], [0], [0], [1], [0, 0, 1, 1], [], []>} : vector<16x64xf32>, vector<64x32xf32>, vector<16x32xf32> -> vector<16x32xf32>
    %c768 = arith.constant 768 : index
    %c0_63 = arith.constant 0 : index
    %172 = vector.load %arg1[%c768, %c0_63] : memref<848x64xf32, #tpu.memory_space<vmem>>, vector<1x32xf32>
    %173 = vector.broadcast %172 : vector<1x32xf32> to vector<16x32xf32>
    %174 = arith.addf %171, %173 : vector<16x32xf32>
    %175 = arith.addf %162, %174 : vector<16x32xf32>
    %c792 = arith.constant 792 : index
    %c0_64 = arith.constant 0 : index
    %176 = vector.load %arg1[%c792, %c0_64] : memref<848x64xf32, #tpu.memory_space<vmem>>, vector<1x32xf32>
    %c800 = arith.constant 800 : index
    %c0_65 = arith.constant 0 : index
    %177 = vector.load %arg1[%c800, %c0_65] : memref<848x64xf32, #tpu.memory_space<vmem>>, vector<1x32xf32>
    %cst_66 = arith.constant dense<0.000000e+00> : vector<16xf32>
    %178 = vector.multi_reduction <add>, %175, %cst_66 [1] : vector<16x32xf32> to vector<16xf32>
    %179 = vector.shape_cast %178 : vector<16xf32> to vector<16x1xf32>
    %cst_67 = arith.constant 3.200000e+01 : f32
    %180 = vector.broadcast %cst_67 : f32 to vector<16x1xf32>
    %181 = arith.divf %179, %180 : vector<16x1xf32>
    %182 = vector.broadcast %181 : vector<16x1xf32> to vector<16x32xf32>
    %183 = arith.subf %175, %182 : vector<16x32xf32>
    %184 = arith.mulf %183, %183 : vector<16x32xf32>
    %cst_68 = arith.constant dense<0.000000e+00> : vector<16xf32>
    %185 = vector.multi_reduction <add>, %184, %cst_68 [1] : vector<16x32xf32> to vector<16xf32>
    %186 = vector.shape_cast %185 : vector<16xf32> to vector<16x1xf32>
    %cst_69 = arith.constant 3.200000e+01 : f32
    %187 = vector.broadcast %cst_69 : f32 to vector<16x1xf32>
    %188 = arith.divf %186, %187 : vector<16x1xf32>
    %189 = vector.broadcast %181 : vector<16x1xf32> to vector<16x32xf32>
    %190 = arith.subf %175, %189 : vector<16x32xf32>
    %cst_70 = arith.constant 9.99999974E-6 : f32
    %191 = vector.broadcast %cst_70 : f32 to vector<16x1xf32>
    %192 = arith.addf %188, %191 : vector<16x1xf32>
    %193 = math.rsqrt %192 : vector<16x1xf32>
    %194 = vector.broadcast %193 : vector<16x1xf32> to vector<16x32xf32>
    %195 = arith.mulf %190, %194 : vector<16x32xf32>
    %196 = vector.broadcast %176 : vector<1x32xf32> to vector<16x32xf32>
    %197 = arith.mulf %195, %196 : vector<16x32xf32>
    %198 = vector.broadcast %177 : vector<1x32xf32> to vector<16x32xf32>
    %199 = arith.addf %197, %198 : vector<16x32xf32>
    %c808 = arith.constant 808 : index
    %c0_71 = arith.constant 0 : index
    %200 = vector.load %arg1[%c808, %c0_71] : memref<848x64xf32, #tpu.memory_space<vmem>>, vector<32x16xf32>
    %cst_72 = arith.constant dense<0.000000e+00> : vector<16x16xf32>
    %201 = tpu.matmul %199, %200, %cst_72 {dimension_numbers = #tpu.dot_dimension_numbers<[1], [0], [0], [1], [0, 0, 1, 1], [], []>} : vector<16x32xf32>, vector<32x16xf32>, vector<16x16xf32> -> vector<16x16xf32>
    %c840 = arith.constant 840 : index
    %c0_73 = arith.constant 0 : index
    %202 = vector.load %arg1[%c840, %c0_73] : memref<848x64xf32, #tpu.memory_space<vmem>>, vector<1x16xf32>
    %203 = vector.broadcast %202 : vector<1x16xf32> to vector<16x16xf32>
    %204 = arith.addf %201, %203 : vector<16x16xf32>
    %c0_74 = arith.constant 0 : index
    %c0_75 = arith.constant 0 : index
    %205 = vector.load %arg2[%c0_74, %c0_75] : memref<16x16xf32, #tpu.memory_space<vmem>>, vector<16x16xf32>
    tpu.vector_store %arg2[%c0_74, %c0_75], %204 {strides = array<i32>} : memref<16x16xf32, #tpu.memory_space<vmem>>, vector<16x16xf32>,
    return
  }
}

</mosaic_0001>

<bundles_post_ra>
// kernel: _lambda_.1
= control target key start
LH: loop header
LB: loop body
LE: loop exit
PB: predicated region body
PF: predicated region fallthrough
CT: control target
= control target key end

     0   :  { %7 = vsyncpa [#allocation3], 0  ;;  %s2578_s0 = inlined_call_operand.hbm [shape: f32[16,20], index: 0, kind: input, shape index: {}]   ;;  %s2579_s1 = inlined_call_operand.hbm [shape: f32[848,64], index: 1, kind: input, shape index: {}]   ;;  %s2580_s2 = inlined_call_operand.hbm [shape: f32[16,16], index: 2, kind: output, shape index: {}]  }
   0x1   :  { %8 = vsyncpa [#allocation6], 0 }
   0x2   :  { %9 = vsyncpa [#allocation4], 0  ;;  %s14_s11 = sshll.u32 %s2578_s0, 4  ;;  %s2150_s12 = smov [#allocation2]   ;;  %s15_s11 = int_to_ptr.hbm [resolvable:$true] %s14_s11 }
   0x3   :  { %s16_s13 = sshll.u32 %s2150_s12, 4  ;;  %s27_s16 = sshll.u32 %s2579_s1, 4  ;;  %s17_s13 = int_to_ptr.vmem [resolvable:$true] %s16_s13  ;;  %s28_s16 = int_to_ptr.hbm [resolvable:$true] %s27_s16 }
   0x4   :  { %s2151_s17 = smov 128   ;;  %s2152_s18 = smov 8  }
   0x5   :  { %22 = dma.hbm_to_vmem [thread:$0]  %s15_s11, 256, %s17_s13, [#allocation3], %s2151_s17, %s2151_s17, %s2152_s18  }
   0x6   :  { %s2153_s19 = smov [#allocation5]  }
   0x7   :  { %s29_s20 = sshll.u32 %s2153_s19, 4  ;;  %s30_s20 = int_to_ptr.vmem [resolvable:$true] %s29_s20 }
   0x8   :  { %35 = dma.hbm_to_vmem [thread:$0]  %s28_s16, 13568, %s30_s20, [#allocation6], %s2151_s17, %s2151_s17, %s2152_s18  }
   0x9   :  { %2144 = dma.done.wait [#allocation3], 256  }
   0xa   :  { %2145 = vsyncadd [#allocation3], 4294967040 }
   0xb   :  { %2146 = dma.done.wait [#allocation6], 13568  }
   0xc   :  { %2147 = vsyncadd [#allocation6], 4294953728  ;;  %vm58_vm0 = vcmask 1043456   ;;  %v48_v0 = vld [vmem:[#allocation5 + $0x10] sm:$0xf]  ;;  %v47_v1 = vld [vmem:[#allocation5 + $0x8] sm:$0xff] }
   0xd   :  { %1827 = vmatpush.msk.msra.mxu0 %vm58_vm0, %v48_v0  ;;  %1920 = vmatpush.msk.msra.mxu3 %vm58_vm0, %v48_v0  ;;  %v46_v2 = vld [vmem:[#allocation5] sm:$0xff]  ;;  %v44_v3 = vld [vmem:[#allocation2] sm:$0xff]  ;;  %v45_v4 = vld [vmem:[#allocation2 + $0x8] sm:$0xff]  ;;  %vm51_vm1 = vcmask 162816   ;;  %vm111_vm2 = vcmask 261120   ;;  %s2154_s0 = smov 120  }
   0xe   :  { %v98_v5 = vld [vmem:[#allocation5 + $0x90] sm:$0xff]  ;;  %v97_v7 = vld [vmem:[#allocation5 + $0x88] sm:$0xff]  ;;  %v96_v9 = vld [vmem:[#allocation5 + $0x80] sm:$0xff]  ;;  %vm216_vm3 = vcmask 64512   ;;  %vm375_vm4 = vcmask 130048   ;;  %s2155_s1 = smov 112  }
   0xf   :  { %76 = vmatpush.msra.mxu0 %v47_v1  ;;  %1921 = vmatpush.msra.mxu3 %v47_v1  ;;  %v102_v6 = vld [vmem:[#allocation5 + $0xb0] sm:$0xff]  ;;  %v101_v8 = vld [vmem:[#allocation5 + $0xa8] sm:$0xff]  ;;  %v100_v10 = vld [vmem:[#allocation5 + $0xa0] sm:$0xff]  ;;  %vm850_vm12 = vcmask 523264   ;;  %s2157_s21 = smov [#allocation7]   ;;  %s1813_s25 = sshll.u32 %s2580_s2, 4  ;;  %s1814_s25 = int_to_ptr.hbm [resolvable:$true] %s1813_s25 }
  0x10   :  { %v90_v11 = vld [vmem:[#allocation5 + $0x50] sm:$0xff]  ;;  %v95_v12 = vld [vmem:[#allocation5 + $0x78] sm:$0xff]  ;;  %v89_v14 = vld [vmem:[#allocation5 + $0x48] sm:$0xff]  ;;  %s1811_s22 = sshll.u32 %s2157_s21, 4  ;;  %s1812_s22 = int_to_ptr.vmem [resolvable:$true] %s1811_s22 }
  0x11   :  { %77 = vmatpush.msra.mxu0 %v46_v2  ;;  %1922 = vmatpush.msra.mxu3 %v46_v2  ;;  %v99_v13 = vld [vmem:[#allocation5 + $0x98] sm:$0xff]  ;;  %v88_v15 = vld [vmem:[#allocation5 + $0x40] sm:$0xff]  ;;  %v94_v17 = vld [vmem:[#allocation5 + $0x70] sm:$0xff] }
  0x12   :  { %1828 = vmatmul.msk.f32.vlgmr.msra.gmra.mxu0 %vm51_vm1, %v44_v3  ;;  %1829 = vmatmul.msk.f32.vlgmr.msra.gmra.mxu3 %vm51_vm1, %v45_v4  ;;  %v87_v16 = vld [vmem:[#allocation5 + $0x38] sm:$0xff]  ;;  %v93_v18 = vld [vmem:[#allocation5 + $0x68] sm:$0xff]  ;;  %v92_v19 = vld [vmem:[#allocation5 + $0x60] sm:$0xff] }
  0x13   :  { %176 = vmatpush.msrb.mxu3 %v98_v5  ;;  %199 = vmatpush.msrb.mxu0 %v102_v6  ;;  %v91_v20 = vld [vmem:[#allocation5 + $0x58] sm:$0xff]  ;;  %v50_v24 = vld [vmem:[#allocation5 + $0x20] sm:$0xff]  ;;  %v105_v32 = vld [vmem:[#allocation5 + $0xc8] sm:$0xff] }
  0x14   :  { %1923 = vmatpush.msra.mxu2 %v90_v11  ;;  %130 = vmatpush.msra.mxu1 %v90_v11  ;;  %v49_v21 = vld [vmem:[#allocation5 + $0x18] sm:$0xff]  ;;  %v104_v27 = vld [vmem:[#allocation5 + $0xc0] sm:$0xff]  ;;  %v106_v38 = vld [vmem:[#allocation5 + $0xd0] sm:$0xff] }
  0x15   :  { %177 = vmatpush.msrb.mxu3 %v97_v7  ;;  %200 = vmatpush.msrb.mxu0 %v101_v8  ;;  %v103_v30 = vld [vmem:[#allocation5 + $0xb8] sm:$0xff]  ;;  %v109_v43 = vld [vmem:[#allocation5 + $0xe8] sm:$0xff]  ;;  %v108_v44 = vld [vmem:[#allocation5 + $0xe0] sm:$0xff] }
  0x16   :  { %1924 = vmatpush.msra.mxu2 %v89_v14  ;;  %131 = vmatpush.msra.mxu1 %v89_v14  ;;  %v107_v37 = vld [vmem:[#allocation5 + $0xd8] sm:$0xff]  ;;  %v110_v48 = vld [vmem:[#allocation5 + $0xf0] sm:$0xff]  ;;  %v2261_v60 = vld [vmem:[#allocation5 + $0x28] sm:$0xff] }
  0x17   :  { %178 = vmatpush.msrb.mxu3 %v96_v9  ;;  %201 = vmatpush.msrb.mxu0 %v100_v10  ;;  %v2265_v1 = vld [vmem:[#allocation5 + $0x30] sm:$0xff] }
  0x18   :  { %1925 = vmatpush.msra.mxu2 %v88_v15  ;;  %132 = vmatpush.msra.mxu1 %v88_v15 }
  0x19   :  { %179 = vmatpush.msrb.mxu3 %v95_v12  ;;  %202 = vmatpush.msrb.mxu0 %v99_v13 }
  0x1a   :  { %1926 = vmatpush.msra.mxu2 %v87_v16  ;;  %133 = vmatpush.msra.mxu1 %v87_v16 }
  0x1c   :  { %153 = vmatpush.msrb.mxu2 %v94_v17 }
  0x1e   :  { %154 = vmatpush.msrb.mxu2 %v93_v18 }
  0x20   :  { %155 = vmatpush.msrb.mxu2 %v92_v19 }
  0x22   :  { %156 = vmatpush.msrb.mxu2 %v91_v20 }
  0x8f   :  { %v79_v22 = vpop.f32.mrf.mxu0 }
  0x90   :  { %v2185_v23 = vadd.f32 %v79_v22, %v49_v21 }
  0x92   :  { %1834 = vmatmul.msk.f32.vlgmr.msrb.gmra.mxu3 %vm111_vm2, %v2185_v23  ;;  %1836 = vmatmul.msk.f32.vlgmr.msrb.gmra.mxu0 %vm111_vm2, %v2185_v23 }
  0x93   :  { %1830 = vmatmul.msk.f32.vlgmr.msra.gmra.mxu1 %vm111_vm2, %v2185_v23 }
  0x95   :  { %v82_v25 = vpop.f32.mrf.mxu3 }
  0x96   :  { %v2193_v26 = vadd.f32 %v82_v25, %v50_v24 }
  0x98   :  { %1831 = vmatmul.msk.f32.vlgmr.msra.gmra.mxu2 %vm111_vm2, %v2193_v26 }
  0x9a   :  { %1835 = vmatmul.msk.f32.gmra.mxu3 %vm111_vm2, %v2193_v26  ;;  %1837 = vmatmul.msk.f32.gmra.mxu0 %vm111_vm2, %v2193_v26 }
  0xa0   :  { %1832 = vmatmul.msk.f32.vlgmr.msrb.gmra.mxu2 %vm111_vm2, %v2185_v23 }
  0xa8   :  { %1833 = vmatmul.msk.f32.gmra.mxu2 %vm111_vm2, %v2193_v26 }
 0x10f   :  { %v204_v42 = vpop.f32.mrf.mxu0 }
 0x110   :  { %v135_v31 = vpop.f32.mrf.mxu1  ;;  %v2225_v46 = vadd.f32 %v204_v42, %v109_v43 }
 0x111   :  { %v2209_v34 = vadd.f32 %v135_v31, %v103_v30 }
 0x115   :  { %v181_v36 = vpop.f32.mrf.mxu3 }
 0x116   :  { %v2217_v40 = vadd.f32 %v181_v36, %v107_v37 }
 0x117   :  { %v207_v49 = vpop.f32.mrf.mxu0 }
 0x118   :  { %v2233_v50 = vadd.f32 %v207_v49, %v110_v48 }
 0x11b   :  { %v138_v28 = vpop.f32.mrf.mxu2 }
 0x11c   :  { %v2205_v29 = vadd.f32 %v138_v28, %v104_v27 }
 0x11d   :  { %v184_v45 = vpop.f32.mrf.mxu3 }
 0x11e   :  { %214 = vrot.lane.b32.xlu2 %v2205_v29, %s2154_s0  ;;  %v2227_v47 = vadd.f32 %v184_v45, %v108_v44  ;;  %v1945_v42 = vpack.i.bf16 %v2209_v34, %v2205_v29 }
 0x123   :  { %v158_v33 = vpop.f32.mrf.mxu2 }
 0x124   :  { %v2211_v35 = vadd.f32 %v158_v33, %v105_v32 }
 0x126   :  { %250 = vrot.lane.b32.xlu1 %v2211_v35, %s2154_s0  ;;  %212 = vrot.lane.b32.xlu2 %v2209_v34, %s2154_s0 }
 0x12b   :  { %v161_v39 = vpop.f32.mrf.mxu2 }
 0x12c   :  { %v2219_v41 = vadd.f32 %v161_v39, %v106_v38 }
 0x12e   :  { %252 = vrot.lane.b32.xlu0 %v2219_v41, %s2154_s0  ;;  %287 = vrot.lane.b32.xlu1 %v2217_v40, %s2154_s0  ;;  %v1935_v32 = vpack.i.bf16 %v2211_v35, %v2219_v41 }
 0x136   :  { %289 = vrot.lane.b32.xlu0 %v2227_v47, %s2154_s0  ;;  %324 = vrot.lane.b32.xlu1 %v2225_v46, %s2154_s0 }
 0x13e   :  { %326 = vrot.lane.b32.xlu0 %v2233_v50, %s2154_s0 }
 0x178   :  { %v215_v51 = vpop.permute.xlu2 %214 }
 0x179   :  { %1838 = vmatpush.xpose.msk.msrb.mxu1 %vm216_vm3, %v215_v51 }
 0x180   :  { %v213_v52 = vpop.permute.xlu2 %212 }
 0x181   :  { %1839 = vmatpush.xpose.msk.msrb.mxu1 %vm216_vm3, %v213_v52 }
 0x184   :  { %1840 = vmatmul.msk.f32.vlgmr.msrb.gmra.mxu1 %vm216_vm3, %v2209_v34 }
 0x18c   :  { %1841 = vmatmul.msk.f32.gmra.mxu1 %vm216_vm3, %v2205_v29 }
 0x198   :  { %v251_v53 = vpop.permute.xlu1 %250 }
 0x1a0   :  { %v253_v54 = vpop.permute.xlu0 %252  ;;  %v288_v56 = vpop.permute.xlu1 %287 }
 0x1a1   :  { %1842 = vmatpush.xpose.msk.msra.mxu2 %vm216_vm3, %v253_v54 }
 0x1a5   :  { %1843 = vmatpush.xpose.msk.msra.mxu2 %vm216_vm3, %v251_v53 }
 0x1a8   :  { %v290_v55 = vpop.permute.xlu0 %289  ;;  %1844 = vmatmul.msk.f32.vlgmr.msra.gmra.mxu2 %vm216_vm3, %v2211_v35  ;;  %v325_v58 = vpop.permute.xlu1 %324 }
 0x1a9   :  { %1846 = vmatpush.xpose.msk.msra.mxu3 %vm216_vm3, %v290_v55 }
 0x1ad   :  { %1847 = vmatpush.xpose.msk.msra.mxu3 %vm216_vm3, %v288_v56 }
 0x1b0   :  { %v327_v57 = vpop.permute.xlu0 %326  ;;  %1845 = vmatmul.msk.f32.gmra.mxu2 %vm216_vm3, %v2219_v41  ;;  %1848 = vmatmul.msk.f32.vlgmr.msra.gmra.mxu3 %vm216_vm3, %v2217_v40 }
 0x1b1   :  { %1850 = vmatpush.xpose.msk.msra.mxu0 %vm216_vm3, %v327_v57 }
 0x1b5   :  { %1851 = vmatpush.xpose.msk.msra.mxu0 %vm216_vm3, %v325_v58 }
 0x1b8   :  { %1849 = vmatmul.msk.f32.gmra.mxu3 %vm216_vm3, %v2227_v47  ;;  %1852 = vmatmul.msk.f32.vlgmr.msra.gmra.mxu0 %vm216_vm3, %v2225_v46 }
 0x1c0   :  { %1853 = vmatmul.msk.f32.gmra.mxu0 %vm216_vm3, %v2233_v50 }
 0x201   :  { %v242_v59 = vpop.f32.mrf.mxu1 }
 0x202   :  { %v359_v61 = vmul.f32 0.35355338, %v242_v59 }
 0x204   :  { %v367_v62 = vadd.f32 %v359_v61, %v2261_v60 }
 0x206   :  { %v376_v63 = vsel %vm375_vm4, %v367_v62, -inf }
 0x207   :  { %377 = vmax.xlane.f32.xlu2 %v376_v63 }
 0x209   :  { %v245_v0 = vpop.f32.mrf.mxu1 }
 0x20a   :  { %v360_v2 = vmul.f32 0.35355338, %v245_v0 }
 0x20c   :  { %v2268_v3 = vadd.f32 %v360_v2, %v2265_v1 }
 0x20e   :  { %v379_v4 = vsel %vm375_vm4, %v2268_v3, -inf }
 0x20f   :  { %380 = vmax.xlane.f32.xlu1 %v379_v4 }
 0x22b   :  { %v279_v5 = vpop.f32.mrf.mxu2 }
 0x22c   :  { %v361_v20 = vmul.f32 0.35355338, %v279_v5 }
 0x22e   :  { %v369_v24 = vadd.f32 %v361_v20, %v2261_v60 }
 0x230   :  { %v382_v28 = vsel %vm375_vm4, %v369_v24, -inf }
 0x233   :  { %v282_v6 = vpop.f32.mrf.mxu2  ;;  %v316_v7 = vpop.f32.mrf.mxu3 }
 0x234   :  { %v362_v8 = vmul.f32 0.35355338, %v282_v6  ;;  %v363_v14 = vmul.f32 0.35355338, %v316_v7 }
 0x235   :  { %v353_v9 = vpop.f32.mrf.mxu0 }
 0x236   :  { %v365_v10 = vmul.f32 0.35355338, %v353_v9  ;;  %v2273_v11 = vadd.f32 %v362_v8, %v2265_v1  ;;  %v371_v19 = vadd.f32 %v363_v14, %v2261_v60 }
 0x238   :  { %v385_v12 = vsel %vm375_vm4, %v2273_v11, -inf  ;;  %v373_v13 = vadd.f32 %v365_v10, %v2261_v60  ;;  %v388_v22 = vsel %vm375_vm4, %v371_v19, -inf }
 0x239   :  { %386 = vmax.xlane.f32.xlu1 %v385_v12  ;;  %v1950_v12 = vpack.i.bf16 %v2225_v46, %v2233_v50 }
 0x23a   :  { %v394_v15 = vsel %vm375_vm4, %v373_v13, -inf }
 0x23b   :  { %v319_v16 = vpop.f32.mrf.mxu3  ;;  %395 = vmax.xlane.f32.xlu0 %v394_v15 }
 0x23c   :  { %v364_v17 = vmul.f32 0.35355338, %v319_v16 }
 0x23d   :  { %v356_v25 = vpop.f32.mrf.mxu0 }
 0x23e   :  { %v372_v18 = vadd.f32 %v364_v17, %v2265_v1  ;;  %v366_v27 = vmul.f32 0.35355338, %v356_v25 }
 0x240   :  { %v391_v21 = vsel %vm375_vm4, %v372_v18, -inf  ;;  %v2286_v30 = vadd.f32 %v366_v27, %v2265_v1 }
 0x241   :  { %392 = vmax.xlane.f32.xlu2 %v391_v21 }
 0x242   :  { %v397_v31 = vsel %vm375_vm4, %v2286_v30, -inf }
 0x243   :  { %389 = vmax.xlane.f32.xlu0 %v388_v22 }
 0x249   :  { %383 = vmax.xlane.f32.xlu2 %v382_v28 }
 0x251   :  { %398 = vmax.xlane.f32.xlu2 %v397_v31 }
 0x269   :  { %1936 = vrot.lane.b32.xlu2 %v1935_v32, %s2155_s1 }
 0x27a   :  { %v378_v33 = vpop.xlane.xlu2 %377 }
 0x27b   :  { %v400_v36 = vsub.f32 %v367_v62, %v378_v33 }
 0x27d   :  { %v408_v37 = vmul.f32 1.442695, %v400_v36 }
 0x27f   :  { %1990 = vpow2.f32 %v408_v37 }
 0x282   :  { %v381_v52 = vpop.xlane.xlu1 %380 }
 0x285   :  { %v2293_v38 = vpop.eup %1990 }
 0x286   :  { %v424_v39 = vsel %vm375_vm4, %v2293_v38, 0.0 }
 0x287   :  { %425 = vadd.xlane.f32.xlu0 %v424_v39 }
 0x29b   :  { %1946 = vrot.lane.b32.xlu0 %v1945_v42, %s2155_s1 }
 0x2ac   :  { %v387_v58 = vpop.xlane.xlu1 %386 }
 0x2ad   :  { %v403_v62 = vsub.f32 %v2273_v11, %v387_v58  ;;  %v1940_v11 = vpack.i.bf16 %v2217_v40, %v2227_v47  ;;  %v606_v58 = vld [vmem:[#allocation5 + $0x108] sm:$0xff] }
 0x2ae   :  { %v396_v43 = vpop.xlane.xlu0 %395 }
 0x2af   :  { %v406_v35 = vsub.f32 %v373_v13, %v396_v43  ;;  %v414_v2 = vmul.f32 1.442695, %v403_v62  ;;  %v401_v13 = vsub.f32 %v2268_v3, %v381_v52 }
 0x2b1   :  { %v420_v41 = vmul.f32 1.442695, %v406_v35  ;;  %v410_v14 = vmul.f32 1.442695, %v401_v13 }
 0x2b3   :  { %1992 = vpow2.f32 %v420_v41 }
 0x2b4   :  { %v393_v44 = vpop.xlane.xlu2 %392 }
 0x2b5   :  { %v405_v45 = vsub.f32 %v372_v18, %v393_v44 }
 0x2b6   :  { %v390_v48 = vpop.xlane.xlu0 %389 }
 0x2b7   :  { %v418_v49 = vmul.f32 1.442695, %v405_v45  ;;  %v404_v51 = vsub.f32 %v371_v19, %v390_v48 }
 0x2b9   :  { %v2300_v53 = vpop.eup %1992  ;;  %v416_v54 = vmul.f32 1.442695, %v404_v51  ;;  %1994 = vpow2.f32 %v418_v49  ;;  %v604_v51 = vld [vmem:[#allocation5 + $0xf8] sm:$0xff] }
 0x2ba   :  { %v442_v55 = vsel %vm375_vm4, %v2300_v53, 0.0 }
 0x2bb   :  { %1996 = vpow2.f32 %v416_v54  ;;  %443 = vadd.xlane.f32.xlu2 %v442_v55 }
 0x2bc   :  { %v384_v29 = vpop.xlane.xlu2 %383 }
 0x2bd   :  { %v402_v34 = vsub.f32 %v369_v24, %v384_v29 }
 0x2bf   :  { %v412_v56 = vmul.f32 1.442695, %v402_v34  ;;  %v2304_v57 = vpop.eup %1994 }
 0x2c0   :  { %v439_v0 = vsel %vm375_vm4, %v2304_v57, 0.0 }
 0x2c1   :  { %v2306_v59 = vpop.eup %1996  ;;  %1998 = vpow2.f32 %v412_v56 }
 0x2c2   :  { %v436_v61 = vsel %vm375_vm4, %v2306_v59, 0.0  ;;  %2000 = vpow2.f32 %v414_v2 }
 0x2c3   :  { %437 = vadd.xlane.f32.xlu1 %v436_v61  ;;  %2002 = vpow2.f32 %v410_v14 }
 0x2c4   :  { %v399_v63 = vpop.xlane.xlu2 %398 }
 0x2c5   :  { %440 = vadd.xlane.f32.xlu0 %v439_v0  ;;  %v407_v15 = vsub.f32 %v2286_v30, %v399_v63 }
 0x2c7   :  { %v1999_v4 = vpop.eup %1998  ;;  %v422_v17 = vmul.f32 1.442695, %v407_v15 }
 0x2c8   :  { %v430_v6 = vsel %vm375_vm4, %v1999_v4, 0.0  ;;  %v2001_v9 = vpop.eup %2000 }
 0x2c9   :  { %v433_v10 = vsel %vm375_vm4, %v2001_v9, 0.0  ;;  %v2003_v16 = vpop.eup %2002 }
 0x2ca   :  { %v427_v19 = vsel %vm375_vm4, %v2003_v16, 0.0 }
 0x2cc   :  { %v1937_v5 = vpop.permute.xlu2 %1936 }
 0x2cd   :  { %v1938_v7 = vunpack.i.l.bf16 %v1937_v5  ;;  %431 = vadd.xlane.f32.xlu0 %v430_v6  ;;  %v1939_v8 = vunpack.i.h.bf16 %v1937_v5 }
 0x2cf   :  { %525 = vmatpush.msrb.mxu2 %v1938_v7 }
 0x2d1   :  { %526 = vmatpush.msrb.mxu2 %v1939_v8 }
 0x2d5   :  { %434 = vadd.xlane.f32.xlu0 %v433_v10 }
 0x2dc   :  { %1941 = vrot.lane.b32.xlu1 %v1940_v11, %s2155_s1 }
 0x2e9   :  { %1951 = vrot.lane.b32.xlu0 %v1950_v12, %s2155_s1 }
 0x2fa   :  { %v426_v18 = vpop.xlane.xlu0 %425 }
 0x2fb   :  { %2004 = vrcp.f32 %v426_v18 }
 0x2fc   :  { %2006 = vpow2.f32 %v422_v17 }
 0x301   :  { %v2005_v47 = vpop.eup %2004 }
 0x302   :  { %v2007_v46 = vpop.eup %2006  ;;  %v456_v3 = vmul.f32 %v2005_v47, %v2293_v38 }
 0x303   :  { %v445_v21 = vsel %vm375_vm4, %v2007_v46, 0.0 }
 0x306   :  { %428 = vadd.xlane.f32.xlu1 %v427_v19 }
 0x30d   :  { %v1947_v40 = vpop.permute.xlu0 %1946 }
 0x30e   :  { %v1948_v20 = vunpack.i.l.bf16 %v1947_v40  ;;  %v1949_v50 = vunpack.i.h.bf16 %v1947_v40 }
 0x310   :  { %490 = vmatpush.msra.mxu1 %v1948_v20 }
 0x312   :  { %491 = vmatpush.msra.mxu1 %v1949_v50 }
 0x313   :  { %1854 = vmatmul.msk.f32.vlgmr.msra.gmra.mxu1 %vm375_vm4, %v456_v3  ;;  %446 = vadd.xlane.f32.xlu0 %v445_v21 }
 0x314   :  { %629 = vmatpush.msrb.mxu1 %v604_v51 }
 0x32e   :  { %v444_v42 = vpop.xlane.xlu2 %443 }
 0x336   :  { %v438_v25 = vpop.xlane.xlu1 %437 }
 0x338   :  { %v441_v22 = vpop.xlane.xlu0 %440 }
 0x340   :  { %v432_v24 = vpop.xlane.xlu0 %431 }
 0x341   :  { %2008 = vrcp.f32 %v432_v24 }
 0x342   :  { %2010 = vrcp.f32 %v438_v25 }
 0x347   :  { %v2009_v27 = vpop.eup %2008 }
 0x348   :  { %v458_v28 = vmul.f32 %v2009_v27, %v1999_v4  ;;  %v435_v30 = vpop.xlane.xlu0 %434  ;;  %v2011_v31 = vpop.eup %2010 }
 0x349   :  { %2012 = vrcp.f32 %v435_v30  ;;  %v460_v39 = vmul.f32 %v2011_v31, %v2306_v59  ;;  %v607_v59 = vld [vmem:[#allocation5 + $0x110] sm:$0xff] }
 0x34a   :  { %1856 = vmatmul.msk.f32.vlgmr.msrb.gmra.mxu2 %vm375_vm4, %v458_v28  ;;  %2014 = vrcp.f32 %v441_v22 }
 0x34b   :  { %2016 = vrcp.f32 %v444_v42 }
 0x34e   :  { %v1942_v32 = vpop.permute.xlu1 %1941 }
 0x34f   :  { %v2013_v33 = vpop.eup %2012  ;;  %v1943_v36 = vunpack.i.l.bf16 %v1942_v32  ;;  %v1944_v38 = vunpack.i.h.bf16 %v1942_v32  ;;  %v2156_v32 = vmov 32.0  }
 0x350   :  { %v459_v37 = vmul.f32 %v2013_v33, %v2001_v9  ;;  %v2015_v43 = vpop.eup %2014 }
 0x351   :  { %560 = vmatpush.msrb.mxu3 %v1943_v36  ;;  %v461_v35 = vmul.f32 %v2015_v43, %v2304_v57  ;;  %v2017_v44 = vpop.eup %2016 }
 0x352   :  { %1857 = vmatmul.msk.f32.gmra.mxu2 %vm375_vm4, %v459_v37  ;;  %v462_v49 = vmul.f32 %v2017_v44, %v2300_v53  ;;  %v605_v53 = vld [vmem:[#allocation5 + $0x100] sm:$0xff] }
 0x353   :  { %561 = vmatpush.msrb.mxu3 %v1944_v38  ;;  %658 = vmatpush.msra.mxu2 %v605_v53 }
 0x354   :  { %1858 = vmatmul.msk.f32.vlgmr.msrb.gmra.mxu3 %vm375_vm4, %v460_v39 }
 0x355   :  { %687 = vmatpush.msra.mxu3 %v606_v58 }
 0x35b   :  { %v1952_v41 = vpop.permute.xlu0 %1951 }
 0x35c   :  { %v1953_v45 = vunpack.i.l.bf16 %v1952_v41  ;;  %1859 = vmatmul.msk.f32.gmra.mxu3 %vm375_vm4, %v461_v35  ;;  %v1954_v48 = vunpack.i.h.bf16 %v1952_v41 }
 0x35e   :  { %595 = vmatpush.msrb.mxu0 %v1953_v45 }
 0x360   :  { %596 = vmatpush.msrb.mxu0 %v1954_v48 }
 0x361   :  { %1860 = vmatmul.msk.f32.vlgmr.msrb.gmra.mxu0 %vm375_vm4, %v462_v49 }
 0x362   :  { %716 = vmatpush.msra.mxu0 %v607_v59 }
 0x379   :  { %v429_v52 = vpop.xlane.xlu1 %428 }
 0x37a   :  { %2018 = vrcp.f32 %v429_v52 }
 0x380   :  { %v2019_v54 = vpop.eup %2018 }
 0x381   :  { %v457_v55 = vmul.f32 %v2019_v54, %v2003_v16  ;;  %v1975_v16 = vld [vmem:[#allocation5 + $0x118] ss:$0 sm:$0xff] }
 0x382   :  { %v806_v54 = vld [vmem:[#allocation5 + $0x138] sm:$0xff] }
 0x383   :  { %1855 = vmatmul.msk.f32.gmra.mxu1 %vm375_vm4, %v457_v55  ;;  %v805_v55 = vld [vmem:[#allocation5 + $0x130] sm:$0xff] }
 0x384   :  { %827 = vmatpush.msra.mxu1 %v806_v54 }
 0x386   :  { %v447_v29 = vpop.xlane.xlu0 %446  ;;  %828 = vmatpush.msra.mxu1 %v805_v55 }
 0x387   :  { %2020 = vrcp.f32 %v447_v29  ;;  %v804_v29 = vld [vmem:[#allocation5 + $0x128] sm:$0xff] }
 0x388   :  { %2022 = vrcp.f32 %v2156_v32  ;;  %829 = vmatpush.msra.mxu1 %v804_v29 }
 0x38d   :  { %v2021_v34 = vpop.eup %2020 }
 0x38e   :  { %v463_v56 = vmul.f32 %v2021_v34, %v2007_v46  ;;  %v2023_v33 = vpop.eup %2022  ;;  %v803_v34 = vld [vmem:[#allocation5 + $0x120] sm:$0xff] }
 0x38f   :  { %v753_v36 = vmul.f32 32.0, %v2023_v33  ;;  %vm757_vm5 = vweird.f32 %v2023_v33  ;;  %830 = vmatpush.msra.mxu1 %v803_v34 }
 0x390   :  { %v493_v57 = vpop.f32.mrf.mxu1  ;;  %1861 = vmatmul.msk.f32.gmra.mxu0 %vm375_vm4, %v463_v56 }
 0x391   :  { %1862 = vmatmul.msk.f32.vlgmr.msrb.gmra.mxu1 %vm216_vm3, %v493_v57  ;;  %v754_v37 = vsub.f32 1.0, %v753_v36  ;;  %v1979_v36 = vld [vmem:[#allocation5 + $0x188] ss:$0 sm:$0xff] }
 0x393   :  { %v755_v38 = vmul.f32 %v2023_v33, %v754_v37 }
 0x395   :  { %v756_v39 = vadd.f32 %v2023_v33, %v755_v38 }
 0x397   :  { %v2357_v42 = vsel %vm757_vm5, %v2023_v33, %v756_v39 }
 0x3cd   :  { %v528_v61 = vpop.f32.mrf.mxu2 }
 0x3ce   :  { %1864 = vmatmul.msk.f32.vlgmr.msra.gmra.mxu2 %vm216_vm3, %v528_v61 }
 0x3d5   :  { %v531_v62 = vpop.f32.mrf.mxu2 }
 0x3d6   :  { %1865 = vmatmul.msk.f32.gmra.mxu2 %vm216_vm3, %v531_v62 }
 0x3d7   :  { %v563_v63 = vpop.f32.mrf.mxu3 }
 0x3d8   :  { %1866 = vmatmul.msk.f32.vlgmr.msra.gmra.mxu3 %vm216_vm3, %v563_v63 }
 0x3de   :  { %v598_v0 = vpop.f32.mrf.mxu0 }
 0x3df   :  { %v566_v2 = vpop.f32.mrf.mxu3  ;;  %1868 = vmatmul.msk.f32.vlgmr.msra.gmra.mxu0 %vm216_vm3, %v598_v0 }
 0x3e0   :  { %1867 = vmatmul.msk.f32.gmra.mxu3 %vm216_vm3, %v566_v2  ;;  %v1976_v2 = vld [vmem:[#allocation5 + $0x190] ss:$0 sm:$0xff] }
 0x400   :  { %v496_v4 = vpop.f32.mrf.mxu1 }
 0x401   :  { %1863 = vmatmul.msk.f32.gmra.mxu1 %vm216_vm3, %v496_v4 }
 0x40d   :  { %v601_v5 = vpop.f32.mrf.mxu0 }
 0x40e   :  { %1869 = vmatmul.msk.f32.gmra.mxu0 %vm216_vm3, %v601_v5  ;;  %v631_v7 = vpop.f32.mrf.mxu1 }
 0x40f   :  { %v724_v9 = vsel %vm111_vm2, %v631_v7, 0.0 }
 0x451   :  { %v660_v6 = vpop.f32.mrf.mxu2 }
 0x452   :  { %v725_v8 = vsel %vm111_vm2, %v660_v6, 0.0  ;;  %v1977_v6 = vld [vmem:[#allocation5 + $0x198] ss:$0 sm:$0xff] }
 0x453   :  { %v726_v10 = vadd.f32 %v725_v8, %v724_v9  ;;  %v847_v9 = vld [vmem:[#allocation5 + $0x180] sm:$0xff] }
 0x454   :  { %865 = vmatpush.msrb.mxu2 %v847_v9  ;;  %v942_v9 = vld [vmem:[#allocation5 + $0x1f0] sm:$0xff] }
 0x459   :  { %v663_v20 = vpop.f32.mrf.mxu2 }
 0x45a   :  { %v732_v50 = vsel %vm111_vm2, %v663_v20, 0.0 }
 0x45b   :  { %v689_v11 = vpop.f32.mrf.mxu3 }
 0x45c   :  { %v727_v12 = vsel %vm111_vm2, %v689_v11, 0.0  ;;  %v718_v13 = vpop.f32.mrf.mxu0  ;;  %v845_v11 = vld [vmem:[#allocation5 + $0x170] sm:$0xff] }
 0x45d   :  { %v728_v14 = vadd.f32 %v727_v12, %v726_v10  ;;  %v729_v15 = vsel %vm111_vm2, %v718_v13, 0.0  ;;  %v846_v10 = vld [vmem:[#allocation5 + $0x178] sm:$0xff] }
 0x45e   :  { %866 = vmatpush.msrb.mxu2 %v846_v10  ;;  %v946_v10 = vld [vmem:[#allocation5 + $0x210] sm:$0xff] }
 0x45f   :  { %v730_v17 = vadd.f32 %v729_v15, %v728_v14  ;;  %v844_v14 = vld [vmem:[#allocation5 + $0x168] sm:$0xff] }
 0x460   :  { %867 = vmatpush.msrb.mxu2 %v845_v11 }
 0x461   :  { %v740_v18 = vadd.f32 %v1975_v16, %v730_v17 }
 0x462   :  { %868 = vmatpush.msrb.mxu2 %v844_v14 }
 0x463   :  { %v742_v19 = vadd.f32 %v740_v18, %v2185_v23  ;;  %v692_v3 = vpop.f32.mrf.mxu3 }
 0x464   :  { %v734_v22 = vsel %vm111_vm2, %v692_v3, 0.0 }
 0x465   :  { %v746_v40 = vsel %vm111_vm2, %v742_v19, 0.0 }
 0x466   :  { %747 = vadd.xlane.f32.xlu2 %v746_v40 }
 0x47e   :  { %v634_v47 = vpop.f32.mrf.mxu1 }
 0x47f   :  { %v731_v46 = vsel %vm111_vm2, %v634_v47, 0.0 }
 0x480   :  { %v733_v21 = vadd.f32 %v732_v50, %v731_v46 }
 0x482   :  { %v735_v25 = vadd.f32 %v734_v22, %v733_v21  ;;  %v842_v22 = vld [vmem:[#allocation5 + $0x158] sm:$0xff] }
 0x48b   :  { %v721_v24 = vpop.f32.mrf.mxu0 }
 0x48c   :  { %v736_v27 = vsel %vm111_vm2, %v721_v24, 0.0  ;;  %v841_v24 = vld [vmem:[#allocation5 + $0x150] sm:$0xff] }
 0x48d   :  { %v737_v28 = vadd.f32 %v736_v27, %v735_v25  ;;  %v840_v25 = vld [vmem:[#allocation5 + $0x148] sm:$0xff]  ;;  %v1978_v27 = vld [vmem:[#allocation5 + $0x140] ss:$0 sm:$0xff] }
 0x48f   :  { %v741_v30 = vadd.f32 %v1975_v16, %v737_v28  ;;  %v843_v16 = vld [vmem:[#allocation5 + $0x160] sm:$0xff] }
 0x490   :  { %869 = vmatpush.msrb.mxu2 %v843_v16 }
 0x491   :  { %v743_v23 = vadd.f32 %v741_v30, %v2193_v26 }
 0x492   :  { %870 = vmatpush.msrb.mxu2 %v842_v22 }
 0x493   :  { %v749_v31 = vsel %vm111_vm2, %v743_v23, 0.0 }
 0x494   :  { %750 = vadd.xlane.f32.xlu1 %v749_v31  ;;  %871 = vmatpush.msrb.mxu2 %v841_v24 }
 0x496   :  { %872 = vmatpush.msrb.mxu2 %v840_v25 }
 0x4d9   :  { %v748_v43 = vpop.xlane.xlu2 %747 }
 0x4da   :  { %v759_v35 = vmul.f32 %v2357_v42, %v748_v43 }
 0x4dc   :  { %v761_v41 = vsub.f32 %v742_v19, %v759_v35 }
 0x4de   :  { %v763_v44 = vmul.f32 %v761_v41, %v761_v41 }
 0x4e0   :  { %v765_v26 = vsel %vm111_vm2, %v763_v44, 0.0 }
 0x4e1   :  { %766 = vadd.xlane.f32.xlu2 %v765_v26 }
 0x507   :  { %v751_v45 = vpop.xlane.xlu1 %750 }
 0x508   :  { %v760_v48 = vmul.f32 %v2357_v42, %v751_v45 }
 0x50a   :  { %v762_v49 = vsub.f32 %v743_v23, %v760_v48 }
 0x50c   :  { %v764_v51 = vmul.f32 %v762_v49, %v762_v49 }
 0x50e   :  { %v768_v52 = vsel %vm111_vm2, %v764_v51, 0.0 }
 0x50f   :  { %769 = vadd.xlane.f32.xlu1 %v768_v52 }
 0x554   :  { %v767_v56 = vpop.xlane.xlu2 %766 }
 0x555   :  { %v771_v57 = vmul.f32 %v767_v56, %v2357_v42 }
 0x557   :  { %v773_v53 = vadd.f32 1e-05, %v771_v57  ;;  %v937_v57 = vld [vmem:[#allocation5 + $0x1c8] sm:$0xff] }
 0x558   :  { %976 = vmatpush.msrb.mxu3 %v937_v57  ;;  %v956_v57 = vld [vmem:[#allocation5 + $0x260] sm:$0xff] }
 0x559   :  { %2024 = vrsqrt.f32 %v773_v53  ;;  %vm781_vm7 = vweird.f32 %v773_v53 }
 0x55f   :  { %v2025_v58 = vpop.eup %2024 }
 0x560   :  { %v776_v59 = vmul.f32 %v2025_v58, %v773_v53  ;;  %vm782_vm6 = vweird.f32 %v2025_v58  ;;  %v941_v53 = vld [vmem:[#allocation5 + $0x1e8] sm:$0xff] }
 0x561   :  { %vm783_vm8 = vmor %vm781_vm7, %vm782_vm6  ;;  %999 = vmatpush.msrb.mxu0 %v941_v53  ;;  %v952_v53 = vld [vmem:[#allocation5 + $0x240] sm:$0xff] }
 0x562   :  { %v777_v61 = vmul.f32 %v2025_v58, %v776_v59  ;;  %v949_v59 = vld [vmem:[#allocation5 + $0x228] sm:$0xff] }
 0x563   :  { %1045 = vmatpush.msra.mxu2 %v949_v59 }
 0x564   :  { %v778_v62 = vmul.f32 0.5, %v777_v61  ;;  %v936_v61 = vld [vmem:[#allocation5 + $0x1c0] sm:$0xff] }
 0x565   :  { %977 = vmatpush.msrb.mxu3 %v936_v61  ;;  %v955_v61 = vld [vmem:[#allocation5 + $0x258] sm:$0xff] }
 0x566   :  { %v779_v63 = vsub.f32 1.5, %v778_v62  ;;  %v940_v62 = vld [vmem:[#allocation5 + $0x1e0] sm:$0xff] }
 0x567   :  { %1000 = vmatpush.msrb.mxu0 %v940_v62 }
 0x568   :  { %v780_v0 = vmul.f32 %v2025_v58, %v779_v63  ;;  %v944_v63 = vld [vmem:[#allocation5 + $0x200] sm:$0xff] }
 0x56a   :  { %v784_v4 = vsel %vm783_vm8, %v2025_v58, %v780_v0  ;;  %v945_v58 = vld [vmem:[#allocation5 + $0x208] sm:$0xff]  ;;  %v948_v0 = vld [vmem:[#allocation5 + $0x220] sm:$0xff] }
 0x56b   :  { %v795_v5 = vmul.f32 %v784_v4, %v761_v41  ;;  %1022 = vmatpush.msrb.mxu1 %v945_v58  ;;  %1046 = vmatpush.msra.mxu2 %v948_v0  ;;  %v939_v4 = vld [vmem:[#allocation5 + $0x1d8] sm:$0xff] }
 0x56c   :  { %1001 = vmatpush.msrb.mxu0 %v939_v4 }
 0x56d   :  { %v798_v7 = vmul.f32 %v1976_v2, %v795_v5  ;;  %1023 = vmatpush.msrb.mxu1 %v944_v63  ;;  %v943_v5 = vld [vmem:[#allocation5 + $0x1f8] sm:$0xff] }
 0x56f   :  { %v801_v8 = vadd.f32 %v1977_v6, %v798_v7  ;;  %v934_v7 = vld [vmem:[#allocation5 + $0x1b0] sm:$0xff]  ;;  %1024 = vmatpush.msrb.mxu1 %v943_v5 }
 0x571   :  { %1870 = vmatmul.msk.f32.vlgmr.msra.gmra.mxu1 %vm111_vm2, %v801_v8 }
 0x572   :  { %1025 = vmatpush.msrb.mxu1 %v942_v9 }
 0x582   :  { %v770_v12 = vpop.xlane.xlu1 %769 }
 0x583   :  { %v772_v13 = vmul.f32 %v770_v12, %v2357_v42 }
 0x585   :  { %v774_v15 = vadd.f32 1e-05, %v772_v13 }
 0x587   :  { %2026 = vrsqrt.f32 %v774_v15  ;;  %vm791_vm10 = vweird.f32 %v774_v15 }
 0x58d   :  { %v2027_v17 = vpop.eup %2026 }
 0x58e   :  { %v786_v18 = vmul.f32 %v2027_v17, %v774_v15  ;;  %vm792_vm9 = vweird.f32 %v2027_v17 }
 0x58f   :  { %vm793_vm11 = vmor %vm791_vm10, %vm792_vm9 }
 0x590   :  { %v787_v19 = vmul.f32 %v2027_v17, %v786_v18 }
 0x592   :  { %v788_v40 = vmul.f32 0.5, %v787_v19 }
 0x594   :  { %v789_v47 = vsub.f32 1.5, %v788_v40  ;;  %v1980_v40 = vld [vmem:[#allocation5 + $0x1a0] ss:$0 sm:$0xff] }
 0x596   :  { %v790_v20 = vmul.f32 %v2027_v17, %v789_v47 }
 0x598   :  { %v794_v46 = vsel %vm793_vm11, %v2027_v17, %v790_v20 }
 0x599   :  { %v796_v50 = vmul.f32 %v794_v46, %v762_v49  ;;  %v1981_v46 = vld [vmem:[#allocation5 + $0x1a8] ss:$0 sm:$0xff] }
 0x59b   :  { %v799_v3 = vmul.f32 %v1976_v2, %v796_v50  ;;  %v935_v2 = vld [vmem:[#allocation5 + $0x1b8] sm:$0xff] }
 0x59c   :  { %978 = vmatpush.msrb.mxu3 %v935_v2 }
 0x59d   :  { %v802_v21 = vadd.f32 %v1977_v6, %v799_v3  ;;  %v947_v6 = vld [vmem:[#allocation5 + $0x218] sm:$0xff] }
 0x59e   :  { %1047 = vmatpush.msra.mxu2 %v947_v6  ;;  %979 = vmatpush.msrb.mxu3 %v934_v7 }
 0x59f   :  { %1871 = vmatmul.msk.f32.gmra.mxu1 %vm111_vm2, %v802_v21 }
 0x5a0   :  { %1048 = vmatpush.msra.mxu2 %v946_v10 }
 0x5ee   :  { %v832_v28 = vpop.f32.mrf.mxu1 }
 0x5ef   :  { %v833_v30 = vadd.f32 %v1978_v27, %v832_v28 }
 0x5f1   :  { %v838_v23 = vmax.f32 %v833_v30, 0.0 }
 0x5f3   :  { %1872 = vmatmul.msk.f32.vlgmr.msrb.gmra.mxu2 %vm850_vm12, %v838_v23 }
 0x61c   :  { %v835_v31 = vpop.f32.mrf.mxu1 }
 0x61d   :  { %v836_v32 = vadd.f32 %v1978_v27, %v835_v31 }
 0x61f   :  { %v839_v33 = vmax.f32 %v836_v32, 0.0 }
 0x621   :  { %1873 = vmatmul.msk.f32.gmra.mxu2 %vm850_vm12, %v839_v33 }
 0x676   :  { %v874_v37 = vpop.f32.mrf.mxu2 }
 0x677   :  { %v875_v38 = vadd.f32 %v1979_v36, %v874_v37 }
 0x679   :  { %v880_v39 = vadd.f32 %v875_v38, %v801_v8  ;;  %v938_v8 = vld [vmem:[#allocation5 + $0x1d0] sm:$0xff] }
 0x67a   :  { %1002 = vmatpush.msrb.mxu0 %v938_v8  ;;  %v950_v38 = vld [vmem:[#allocation5 + $0x230] sm:$0xff] }
 0x67b   :  { %v884_v43 = vsel %vm111_vm2, %v880_v39, 0.0 }
 0x67c   :  { %885 = vadd.xlane.f32.xlu2 %v884_v43 }
 0x6a4   :  { %v877_v35 = vpop.f32.mrf.mxu2 }
 0x6a5   :  { %v878_v41 = vadd.f32 %v1979_v36, %v877_v35 }
 0x6a7   :  { %v881_v44 = vadd.f32 %v878_v41, %v802_v21  ;;  %v953_v41 = vld [vmem:[#allocation5 + $0x248] sm:$0xff] }
 0x6a9   :  { %v887_v26 = vsel %vm111_vm2, %v881_v44, 0.0 }
 0x6aa   :  { %888 = vadd.xlane.f32.xlu1 %v887_v26 }
 0x6ef   :  { %v886_v45 = vpop.xlane.xlu2 %885 }
 0x6f0   :  { %v890_v48 = vmul.f32 %v886_v45, %v2357_v42 }
 0x6f2   :  { %v892_v49 = vsub.f32 %v880_v39, %v890_v48  ;;  %v951_v48 = vld [vmem:[#allocation5 + $0x238] sm:$0xff] }
 0x6f4   :  { %v894_v51 = vmul.f32 %v892_v49, %v892_v49 }
 0x6f6   :  { %v896_v52 = vsel %vm111_vm2, %v894_v51, 0.0  ;;  %v954_v51 = vld [vmem:[#allocation5 + $0x250] sm:$0xff] }
 0x6f7   :  { %897 = vadd.xlane.f32.xlu2 %v896_v52 }
 0x71d   :  { %v889_v54 = vpop.xlane.xlu1 %888 }
 0x71e   :  { %v891_v55 = vmul.f32 %v889_v54, %v2357_v42 }
 0x720   :  { %v2374_v29 = vsub.f32 %v881_v44, %v891_v55 }
 0x722   :  { %v895_v34 = vmul.f32 %v2374_v29, %v2374_v29 }
 0x724   :  { %v899_v56 = vsel %vm111_vm2, %v895_v34, 0.0 }
 0x725   :  { %900 = vadd.xlane.f32.xlu1 %v899_v56 }
 0x76a   :  { %v898_v11 = vpop.xlane.xlu2 %897 }
 0x76b   :  { %v902_v12 = vmul.f32 %v898_v11, %v2357_v42 }
 0x76d   :  { %v904_v13 = vadd.f32 1e-05, %v902_v12 }
 0x76f   :  { %2028 = vrsqrt.f32 %v904_v13  ;;  %vm912_vm14 = vweird.f32 %v904_v13 }
 0x775   :  { %v2029_v14 = vpop.eup %2028 }
 0x776   :  { %v907_v15 = vmul.f32 %v2029_v14, %v904_v13  ;;  %vm913_vm13 = vweird.f32 %v2029_v14 }
 0x777   :  { %vm914_vm15 = vmor %vm912_vm14, %vm913_vm13 }
 0x778   :  { %v908_v16 = vmul.f32 %v2029_v14, %v907_v15 }
 0x77a   :  { %v909_v17 = vmul.f32 0.5, %v908_v16 }
 0x77c   :  { %v910_v18 = vsub.f32 1.5, %v909_v17 }
 0x77e   :  { %v911_v19 = vmul.f32 %v2029_v14, %v910_v18 }
 0x780   :  { %v915_v47 = vsel %vm914_vm15, %v2029_v14, %v911_v19 }
 0x781   :  { %v926_v20 = vmul.f32 %v915_v47, %v892_v49  ;;  %v957_v49 = vld [vmem:[#allocation5 + $0x268] sm:$0xff] }
 0x783   :  { %v929_v50 = vmul.f32 %v1980_v40, %v926_v20 }
 0x785   :  { %v2380_v3 = vadd.f32 %v1981_v46, %v929_v50 }
 0x787   :  { %1874 = vmatmul.msk.f32.vlgmr.msrb.gmra.mxu3 %vm111_vm2, %v2380_v3  ;;  %1876 = vmatmul.msk.f32.vlgmr.msrb.gmra.mxu0 %vm111_vm2, %v2380_v3 }
 0x788   :  { %1878 = vmatmul.msk.f32.vlgmr.msrb.gmra.mxu1 %vm111_vm2, %v2380_v3  ;;  %1880 = vmatmul.msk.f32.vlgmr.msra.gmra.mxu2 %vm111_vm2, %v2380_v3 }
 0x798   :  { %v901_v21 = vpop.xlane.xlu1 %900 }
 0x799   :  { %v903_v22 = vmul.f32 %v901_v21, %v2357_v42 }
 0x79b   :  { %v905_v24 = vadd.f32 1e-05, %v903_v22 }
 0x79d   :  { %2030 = vrsqrt.f32 %v905_v24  ;;  %vm922_vm1 = vweird.f32 %v905_v24 }
 0x7a3   :  { %v2031_v25 = vpop.eup %2030 }
 0x7a4   :  { %v917_v27 = vmul.f32 %v2031_v25, %v905_v24  ;;  %vm923_vm0 = vweird.f32 %v2031_v25 }
 0x7a5   :  { %vm924_vm5 = vmor %vm922_vm1, %vm923_vm0 }
 0x7a6   :  { %v918_v28 = vmul.f32 %v2031_v25, %v917_v27 }
 0x7a8   :  { %v919_v30 = vmul.f32 0.5, %v918_v28 }
 0x7aa   :  { %v920_v23 = vsub.f32 1.5, %v919_v30 }
 0x7ac   :  { %v921_v31 = vmul.f32 %v2031_v25, %v920_v23 }
 0x7ae   :  { %v925_v32 = vsel %vm924_vm5, %v2031_v25, %v921_v31 }
 0x7af   :  { %v927_v33 = vmul.f32 %v925_v32, %v2374_v29 }
 0x7b1   :  { %v930_v36 = vmul.f32 %v1980_v40, %v927_v33 }
 0x7b3   :  { %v2392_v37 = vadd.f32 %v1981_v46, %v930_v36 }
 0x7b5   :  { %1875 = vmatmul.msk.f32.gmra.mxu3 %vm111_vm2, %v2392_v37  ;;  %1877 = vmatmul.msk.f32.gmra.mxu0 %vm111_vm2, %v2392_v37 }
 0x7b6   :  { %1879 = vmatmul.msk.f32.gmra.mxu1 %vm111_vm2, %v2392_v37  ;;  %1881 = vmatmul.msk.f32.gmra.mxu2 %vm111_vm2, %v2392_v37 }
 0x804   :  { %v1004_v35 = vpop.f32.mrf.mxu0 }
 0x805   :  { %v1027_v52 = vpop.f32.mrf.mxu1  ;;  %v2424_v59 = vadd.f32 %v1004_v35, %v952_v53 }
 0x806   :  { %v2414_v56 = vadd.f32 %v1027_v52, %v954_v51 }
 0x80a   :  { %v981_v39 = vpop.f32.mrf.mxu3 }
 0x80b   :  { %v2402_v43 = vadd.f32 %v981_v39, %v950_v38  ;;  %v1050_v44 = vpop.f32.mrf.mxu2 }
 0x80c   :  { %v2422_v58 = vadd.f32 %v1050_v44, %v956_v57 }
 0x80d   :  { %1058 = vrot.lane.b32.xlu2 %v2402_v43, %s2154_s0 }
 0x832   :  { %v1007_v26 = vpop.f32.mrf.mxu0 }
 0x833   :  { %v2406_v45 = vadd.f32 %v1007_v26, %v953_v41  ;;  %v1030_v62 = vpop.f32.mrf.mxu1 }
 0x834   :  { %v2430_v63 = vadd.f32 %v1030_v62, %v955_v61 }
 0x835   :  { %1097 = vrot.lane.b32.xlu2 %v2406_v45, %s2154_s0  ;;  %v1965_v26 = vpack.i.bf16 %v2424_v59, %v2406_v45 }
 0x838   :  { %v984_v54 = vpop.f32.mrf.mxu3 }
 0x839   :  { %v2410_v55 = vadd.f32 %v984_v54, %v951_v48  ;;  %v1053_v29 = vpop.f32.mrf.mxu2 }
 0x83a   :  { %v2412_v34 = vadd.f32 %v1053_v29, %v957_v49 }
 0x83b   :  { %1060 = vrot.lane.b32.xlu0 %v2410_v55, %s2154_s0  ;;  %v1955_v48 = vpack.i.bf16 %v2402_v43, %v2410_v55 }
 0x83c   :  { %1171 = vrot.lane.b32.xlu1 %v2412_v34, %s2154_s0  ;;  %v1960_v44 = vpack.i.bf16 %v2422_v58, %v2412_v34 }
 0x83d   :  { %1132 = vrot.lane.b32.xlu2 %v2414_v56, %s2154_s0 }
 0x843   :  { %1169 = vrot.lane.b32.xlu0 %v2422_v58, %s2154_s0 }
 0x844   :  { %1095 = vrot.lane.b32.xlu1 %v2424_v59, %s2154_s0 }
 0x84b   :  { %1134 = vrot.lane.b32.xlu0 %v2430_v63, %s2154_s0 }
 0x867   :  { %v1059_v0 = vpop.permute.xlu2 %1058 }
 0x88f   :  { %v1098_v2 = vpop.permute.xlu2 %1097 }
 0x890   :  { %1886 = vmatpush.xpose.msk.msra.mxu0 %vm216_vm3, %v1098_v2 }
 0x897   :  { %v1133_v9 = vpop.permute.xlu2 %1132 }
 0x8ad   :  { %v1061_v4 = vpop.permute.xlu0 %1060 }
 0x8ae   :  { %v1172_v5 = vpop.permute.xlu1 %1171  ;;  %1882 = vmatpush.xpose.msk.msra.mxu3 %vm216_vm3, %v1061_v4 }
 0x8af   :  { %1894 = vmatpush.xpose.msk.msrb.mxu2 %vm216_vm3, %v1172_v5 }
 0x8b2   :  { %1883 = vmatpush.xpose.msk.msra.mxu3 %vm216_vm3, %v1059_v0 }
 0x8b5   :  { %1884 = vmatmul.msk.f32.vlgmr.msra.gmra.mxu3 %vm216_vm3, %v2402_v43  ;;  %v1170_v6 = vpop.permute.xlu0 %1169 }
 0x8b6   :  { %v1096_v7 = vpop.permute.xlu1 %1095  ;;  %1895 = vmatpush.xpose.msk.msrb.mxu2 %vm216_vm3, %v1170_v6 }
 0x8b7   :  { %1887 = vmatpush.xpose.msk.msra.mxu0 %vm216_vm3, %v1096_v7 }
 0x8b9   :  { %1896 = vmatmul.msk.f32.vlgmr.msrb.gmra.mxu2 %vm216_vm3, %v2422_v58 }
 0x8ba   :  { %1888 = vmatmul.msk.f32.vlgmr.msra.gmra.mxu0 %vm216_vm3, %v2424_v59 }
 0x8bd   :  { %1885 = vmatmul.msk.f32.gmra.mxu3 %vm216_vm3, %v2410_v55  ;;  %v1135_v8 = vpop.permute.xlu0 %1134 }
 0x8be   :  { %1890 = vmatpush.xpose.msk.msra.mxu1 %vm216_vm3, %v1135_v8 }
 0x8c1   :  { %1897 = vmatmul.msk.f32.gmra.mxu2 %vm216_vm3, %v2412_v34 }
 0x8c2   :  { %1889 = vmatmul.msk.f32.gmra.mxu0 %vm216_vm3, %v2406_v45  ;;  %1891 = vmatpush.xpose.msk.msra.mxu1 %vm216_vm3, %v1133_v9 }
 0x8c5   :  { %1892 = vmatmul.msk.f32.vlgmr.msra.gmra.mxu1 %vm216_vm3, %v2414_v56 }
 0x8cd   :  { %1893 = vmatmul.msk.f32.gmra.mxu1 %vm216_vm3, %v2430_v63 }
 0x937   :  { %v1124_v10 = vpop.f32.mrf.mxu0 }
 0x938   :  { %v1206_v11 = vmul.f32 0.35355338, %v1124_v10  ;;  %v1087_v12 = vpop.f32.mrf.mxu3 }
 0x939   :  { %v1204_v14 = vmul.f32 0.35355338, %v1087_v12 }
 0x93a   :  { %v1214_v13 = vadd.f32 %v1206_v11, %v2261_v60 }
 0x93b   :  { %v1212_v40 = vadd.f32 %v1204_v14, %v2261_v60 }
 0x93c   :  { %v1226_v15 = vsel %vm375_vm4, %v1214_v13, -inf  ;;  %v1198_v16 = vpop.f32.mrf.mxu2 }
 0x93d   :  { %1227 = vmax.xlane.f32.xlu0 %v1226_v15  ;;  %v1210_v17 = vmul.f32 0.35355338, %v1198_v16  ;;  %v1220_v24 = vsel %vm375_vm4, %v1212_v40, -inf }
 0x93f   :  { %v1218_v18 = vadd.f32 %v1210_v17, %v2261_v60  ;;  %v1127_v47 = vpop.f32.mrf.mxu0 }
 0x940   :  { %v1090_v19 = vpop.f32.mrf.mxu3  ;;  %v1207_v22 = vmul.f32 0.35355338, %v1127_v47 }
 0x941   :  { %v1205_v20 = vmul.f32 0.35355338, %v1090_v19  ;;  %v1238_v46 = vsel %vm375_vm4, %v1218_v18, -inf }
 0x942   :  { %1239 = vmax.xlane.f32.xlu1 %v1238_v46  ;;  %v1161_v50 = vpop.f32.mrf.mxu1  ;;  %v2467_v28 = vadd.f32 %v1207_v22, %v2265_v1 }
 0x943   :  { %v1213_v21 = vadd.f32 %v1205_v20, %v2265_v1  ;;  %v1208_v25 = vmul.f32 0.35355338, %v1161_v50 }
 0x944   :  { %v1201_v32 = vpop.f32.mrf.mxu2  ;;  %v1229_v33 = vsel %vm375_vm4, %v2467_v28, -inf }
 0x945   :  { %1221 = vmax.xlane.f32.xlu0 %v1220_v24  ;;  %v1223_v27 = vsel %vm375_vm4, %v1213_v21, -inf  ;;  %v1216_v30 = vadd.f32 %v1208_v25, %v2261_v60  ;;  %v1211_v39 = vmul.f32 0.35355338, %v1201_v32 }
 0x946   :  { %1224 = vmax.xlane.f32.xlu2 %v1223_v27 }
 0x947   :  { %v1232_v36 = vsel %vm375_vm4, %v1216_v30, -inf  ;;  %v1219_v60 = vadd.f32 %v1211_v39, %v2265_v1 }
 0x949   :  { %v1241_v41 = vsel %vm375_vm4, %v1219_v60, -inf }
 0x94a   :  { %v1164_v23 = vpop.f32.mrf.mxu1 }
 0x94b   :  { %v1209_v31 = vmul.f32 0.35355338, %v1164_v23 }
 0x94d   :  { %1230 = vmax.xlane.f32.xlu0 %v1229_v33  ;;  %v2474_v38 = vadd.f32 %v1209_v31, %v2265_v1 }
 0x94e   :  { %1233 = vmax.xlane.f32.xlu2 %v1232_v36 }
 0x94f   :  { %v1235_v35 = vsel %vm375_vm4, %v2474_v38, -inf }
 0x950   :  { %1236 = vmax.xlane.f32.xlu1 %v1235_v35 }
 0x958   :  { %1242 = vmax.xlane.f32.xlu1 %v1241_v41 }
 0x961   :  { %1961 = vrot.lane.b32.xlu0 %v1960_v44, %s2155_s1 }
 0x969   :  { %1966 = vrot.lane.b32.xlu0 %v1965_v26, %s2155_s1 }
 0x971   :  { %1956 = vrot.lane.b32.xlu1 %v1955_v48, %s2155_s1 }
 0x9b0   :  { %v1228_v49 = vpop.xlane.xlu0 %1227 }
 0x9b1   :  { %v1246_v1 = vsub.f32 %v1214_v13, %v1228_v49 }
 0x9b3   :  { %v1256_v51 = vmul.f32 1.442695, %v1246_v1 }
 0x9b5   :  { %2032 = vpow2.f32 %v1256_v51  ;;  %v1240_v52 = vpop.xlane.xlu1 %1239 }
 0x9b6   :  { %v1250_v54 = vsub.f32 %v1218_v18, %v1240_v52 }
 0x9b8   :  { %v1264_v29 = vmul.f32 1.442695, %v1250_v54  ;;  %v1222_v34 = vpop.xlane.xlu0 %1221 }
 0x9b9   :  { %v1244_v57 = vsub.f32 %v1212_v40, %v1222_v34  ;;  %v1225_v53 = vpop.xlane.xlu2 %1224  ;;  %v1970_v40 = vpack.i.bf16 %v2414_v56, %v2430_v63 }
 0x9ba   :  { %2034 = vpow2.f32 %v1264_v29  ;;  %v1245_v59 = vsub.f32 %v1213_v21, %v1225_v53 }
 0x9bb   :  { %v2489_v58 = vpop.eup %2032  ;;  %v1252_v45 = vmul.f32 1.442695, %v1244_v57 }
 0x9bc   :  { %v1274_v43 = vsel %vm375_vm4, %v2489_v58, 0.0  ;;  %v1254_v55 = vmul.f32 1.442695, %v1245_v59 }
 0x9bd   :  { %2036 = vpow2.f32 %v1252_v45  ;;  %1275 = vadd.xlane.f32.xlu2 %v1274_v43 }
 0x9be   :  { %2038 = vpow2.f32 %v1254_v55 }
 0x9c0   :  { %v2493_v61 = vpop.eup %2034  ;;  %v1231_v9 = vpop.xlane.xlu0 %1230 }
 0x9c1   :  { %v1234_v62 = vpop.xlane.xlu2 %1233  ;;  %v1286_v0 = vsel %vm375_vm4, %v2493_v61, 0.0  ;;  %v1247_v15 = vsub.f32 %v2467_v28, %v1231_v9 }
 0x9c2   :  { %v1248_v2 = vsub.f32 %v1216_v30, %v1234_v62  ;;  %1287 = vadd.xlane.f32.xlu0 %v1286_v0  ;;  %v1449_v0 = vld [vmem:[#allocation5 + $0x278] sm:$0xff] }
 0x9c3   :  { %v2497_v4 = vpop.eup %2036  ;;  %v1237_v5 = vpop.xlane.xlu1 %1236  ;;  %v1258_v17 = vmul.f32 1.442695, %v1247_v15 }
 0x9c4   :  { %v1260_v6 = vmul.f32 1.442695, %v1248_v2  ;;  %v1268_v7 = vsel %vm375_vm4, %v2497_v4, 0.0  ;;  %v2501_v8 = vpop.eup %2038  ;;  %v1249_v20 = vsub.f32 %v2474_v38, %v1237_v5  ;;  %v1451_v2 = vld [vmem:[#allocation5 + $0x288] sm:$0xff]  ;;  %v1450_v5 = vld [vmem:[#allocation5 + $0x280] sm:$0xff] }
 0x9c5   :  { %1269 = vadd.xlane.f32.xlu2 %v1268_v7  ;;  %v1271_v13 = vsel %vm375_vm4, %v2501_v8, 0.0 }
 0x9c6   :  { %2040 = vpow2.f32 %v1260_v6  ;;  %v1262_v21 = vmul.f32 1.442695, %v1249_v20 }
 0x9cb   :  { %v1243_v10 = vpop.xlane.xlu1 %1242 }
 0x9cc   :  { %v2503_v11 = vpop.eup %2040  ;;  %v1251_v12 = vsub.f32 %v1219_v60, %v1243_v10 }
 0x9cd   :  { %1272 = vadd.xlane.f32.xlu2 %v1271_v13  ;;  %v1280_v14 = vsel %vm375_vm4, %v2503_v11, 0.0 }
 0x9ce   :  { %v1266_v16 = vmul.f32 1.442695, %v1251_v12  ;;  %1281 = vadd.xlane.f32.xlu1 %v1280_v14 }
 0x9d0   :  { %2042 = vpow2.f32 %v1266_v16 }
 0x9d1   :  { %2044 = vpow2.f32 %v1258_v17 }
 0x9d2   :  { %2046 = vpow2.f32 %v1262_v21 }
 0x9d3   :  { %v1962_v18 = vpop.permute.xlu0 %1961 }
 0x9d4   :  { %v1963_v19 = vunpack.i.l.bf16 %v1962_v18  ;;  %v1964_v46 = vunpack.i.h.bf16 %v1962_v18 }
 0x9d6   :  { %v2043_v47 = vpop.eup %2042  ;;  %1439 = vmatpush.msra.mxu2 %v1963_v19  ;;  %1971 = vrot.lane.b32.xlu0 %v1970_v40, %s2155_s1 }
 0x9d7   :  { %v1289_v50 = vsel %vm375_vm4, %v2043_v47, 0.0  ;;  %v2045_v24 = vpop.eup %2044 }
 0x9d8   :  { %1440 = vmatpush.msra.mxu2 %v1964_v46  ;;  %1290 = vadd.xlane.f32.xlu2 %v1289_v50  ;;  %v1277_v56 = vsel %vm375_vm4, %v2045_v24, 0.0  ;;  %v2047_v28 = vpop.eup %2046  ;;  %v1982_v46 = vld [vmem:[#allocation5 + $0x290] ss:$0 sm:$0xff] }
 0x9d9   :  { %v1283_v31 = vsel %vm375_vm4, %v2047_v28, 0.0 }
 0x9da   :  { %1560 = vmatpush.msrb.mxu2 %v1451_v2  ;;  %v1683_v2 = vld [vmem:[#allocation5 + $0x2f0] sm:$0xff] }
 0x9db   :  { %v1967_v22 = vpop.permute.xlu0 %1966 }
 0x9dc   :  { %v1968_v25 = vunpack.i.l.bf16 %v1967_v22  ;;  %v1969_v27 = vunpack.i.h.bf16 %v1967_v22 }
 0x9de   :  { %1369 = vmatpush.msrb.mxu0 %v1968_v25 }
 0x9e0   :  { %1370 = vmatpush.msrb.mxu0 %v1969_v27  ;;  %1278 = vadd.xlane.f32.xlu2 %v1277_v56 }
 0x9e2   :  { %1502 = vmatpush.msra.mxu0 %v1449_v0  ;;  %v1684_v0 = vld [vmem:[#allocation5 + $0x2f8] sm:$0xff] }
 0x9e3   :  { %v1957_v63 = vpop.permute.xlu1 %1956 }
 0x9e4   :  { %v1958_v30 = vunpack.i.l.bf16 %v1957_v63  ;;  %v1959_v23 = vunpack.i.h.bf16 %v1957_v63 }
 0x9e6   :  { %1334 = vmatpush.msrb.mxu3 %v1958_v30 }
 0x9e8   :  { %1335 = vmatpush.msrb.mxu3 %v1959_v23  ;;  %1284 = vadd.xlane.f32.xlu2 %v1283_v31 }
 0xa30   :  { %v1276_v32 = vpop.xlane.xlu2 %1275 }
 0xa31   :  { %2048 = vrcp.f32 %v1276_v32 }
 0xa35   :  { %v1288_v33 = vpop.xlane.xlu0 %1287 }
 0xa36   :  { %2050 = vrcp.f32 %v1288_v33 }
 0xa37   :  { %v2049_v36 = vpop.eup %2048 }
 0xa38   :  { %v1302_v38 = vmul.f32 %v2049_v36, %v2489_v58  ;;  %v1270_v39 = vpop.xlane.xlu2 %1269 }
 0xa39   :  { %2052 = vrcp.f32 %v1270_v39 }
 0xa3a   :  { %1900 = vmatmul.msk.f32.vlgmr.msrb.gmra.mxu0 %vm375_vm4, %v1302_v38 }
 0xa3b   :  { %1701 = vmatpush.msrb.mxu0 %v1684_v0 }
 0xa3c   :  { %v2051_v35 = vpop.eup %2050 }
 0xa3d   :  { %v1306_v60 = vmul.f32 %v2051_v35, %v2493_v61  ;;  %1702 = vmatpush.msrb.mxu0 %v1683_v2 }
 0xa3f   :  { %v2053_v41 = vpop.eup %2052  ;;  %1904 = vmatmul.msk.f32.vlgmr.msra.gmra.mxu2 %vm375_vm4, %v1306_v60 }
 0xa40   :  { %v1300_v44 = vmul.f32 %v2053_v41, %v2497_v4  ;;  %v1273_v26 = vpop.xlane.xlu2 %1272  ;;  %v1448_v4 = vld [vmem:[#allocation5 + $0x270] sm:$0xff] }
 0xa41   :  { %2054 = vrcp.f32 %v1273_v26  ;;  %v1282_v48 = vpop.xlane.xlu1 %1281  ;;  %1473 = vmatpush.msra.mxu3 %v1448_v4 }
 0xa42   :  { %1898 = vmatmul.msk.f32.vlgmr.msrb.gmra.mxu3 %vm375_vm4, %v1300_v44  ;;  %2056 = vrcp.f32 %v1282_v48 }
 0xa47   :  { %v2055_v49 = vpop.eup %2054 }
 0xa48   :  { %v1972_v1 = vpop.permute.xlu0 %1971  ;;  %v1301_v51 = vmul.f32 %v2055_v49, %v2501_v8  ;;  %v2057_v52 = vpop.eup %2056 }
 0xa49   :  { %v1973_v54 = vunpack.i.l.bf16 %v1972_v1  ;;  %v1974_v29 = vunpack.i.h.bf16 %v1972_v1  ;;  %v1304_v57 = vmul.f32 %v2057_v52, %v2503_v11 }
 0xa4a   :  { %1899 = vmatmul.msk.f32.gmra.mxu3 %vm375_vm4, %v1301_v51 }
 0xa4b   :  { %v1291_v34 = vpop.xlane.xlu2 %1290  ;;  %1404 = vmatpush.msrb.mxu1 %v1973_v54 }
 0xa4c   :  { %2058 = vrcp.f32 %v1291_v34  ;;  %v1641_v34 = vld [vmem:[#allocation5 + $0x2a0] sm:$0xff] }
 0xa4d   :  { %1405 = vmatpush.msrb.mxu1 %v1974_v29  ;;  %v1642_v29 = vld [vmem:[#allocation5 + $0x2a8] sm:$0xff] }
 0xa4e   :  { %1902 = vmatmul.msk.f32.vlgmr.msrb.gmra.mxu1 %vm375_vm4, %v1304_v57  ;;  %v1640_v57 = vld [vmem:[#allocation5 + $0x298] sm:$0xff] }
 0xa4f   :  { %1531 = vmatpush.msra.mxu1 %v1450_v5  ;;  %v1682_v5 = vld [vmem:[#allocation5 + $0x2e8] sm:$0xff] }
 0xa50   :  { %1703 = vmatpush.msrb.mxu0 %v1682_v5 }
 0xa52   :  { %v2059_v53 = vpop.eup %2058 }
 0xa53   :  { %v1279_v58 = vpop.xlane.xlu2 %1278  ;;  %v1307_v45 = vmul.f32 %v2059_v53, %v2043_v47 }
 0xa54   :  { %2060 = vrcp.f32 %v1279_v58 }
 0xa55   :  { %1905 = vmatmul.msk.f32.gmra.mxu2 %vm375_vm4, %v1307_v45 }
 0xa5a   :  { %v2061_v59 = vpop.eup %2060 }
 0xa5b   :  { %v1285_v43 = vpop.xlane.xlu2 %1284  ;;  %v1303_v55 = vmul.f32 %v2061_v59, %v2045_v24 }
 0xa5c   :  { %2062 = vrcp.f32 %v1285_v43 }
 0xa5d   :  { %1901 = vmatmul.msk.f32.gmra.mxu0 %vm375_vm4, %v1303_v55 }
 0xa62   :  { %v2063_v61 = vpop.eup %2062 }
 0xa63   :  { %v1305_v62 = vmul.f32 %v2063_v61, %v2047_v28 }
 0xa65   :  { %1903 = vmatmul.msk.f32.gmra.mxu1 %vm375_vm4, %v1305_v62 }
 0xab7   :  { %v1372_v6 = vpop.f32.mrf.mxu0 }
 0xab8   :  { %1908 = vmatmul.msk.f32.vlgmr.msra.gmra.mxu0 %vm216_vm3, %v1372_v6  ;;  %v1983_v6 = vld [vmem:[#allocation5 + $0x308] ss:$0 sm:$0xff] }
 0xac2   :  { %v1442_v7 = vpop.f32.mrf.mxu2 }
 0xac3   :  { %1912 = vmatmul.msk.f32.vlgmr.msrb.gmra.mxu2 %vm216_vm3, %v1442_v7 }
 0xac5   :  { %v1337_v8 = vpop.f32.mrf.mxu3 }
 0xac6   :  { %1906 = vmatmul.msk.f32.vlgmr.msra.gmra.mxu3 %vm216_vm3, %v1337_v8 }
 0xacb   :  { %v1407_v9 = vpop.f32.mrf.mxu1 }
 0xacc   :  { %1910 = vmatmul.msk.f32.vlgmr.msra.gmra.mxu1 %vm216_vm3, %v1407_v9 }
 0xacd   :  { %v1340_v10 = vpop.f32.mrf.mxu3 }
 0xace   :  { %1907 = vmatmul.msk.f32.gmra.mxu3 %vm216_vm3, %v1340_v10  ;;  %v1681_v10 = vld [vmem:[#allocation5 + $0x2e0] sm:$0xff] }
 0xacf   :  { %1704 = vmatpush.msrb.mxu0 %v1681_v10 }
 0xad8   :  { %v1445_v11 = vpop.f32.mrf.mxu2 }
 0xad9   :  { %1913 = vmatmul.msk.f32.gmra.mxu2 %vm216_vm3, %v1445_v11 }
 0xada   :  { %v1375_v12 = vpop.f32.mrf.mxu0 }
 0xadb   :  { %1909 = vmatmul.msk.f32.gmra.mxu0 %vm216_vm3, %v1375_v12  ;;  %v1984_v12 = vld [vmem:[#allocation5 + $0x310] ss:$0 sm:$0xff] }
 0xae2   :  { %v1410_v13 = vpop.f32.mrf.mxu1 }
 0xae3   :  { %1911 = vmatmul.msk.f32.gmra.mxu1 %vm216_vm3, %v1410_v13 }
 0xb35   :  { %v1504_v14 = vpop.f32.mrf.mxu0 }
 0xb36   :  { %v1569_v17 = vsel %vm111_vm2, %v1504_v14, 0.0  ;;  %v1680_v14 = vld [vmem:[#allocation5 + $0x2d8] sm:$0xff] }
 0xb37   :  { %1705 = vmatpush.msrb.mxu0 %v1680_v14 }
 0xb46   :  { %v1562_v40 = vpop.f32.mrf.mxu2 }
 0xb47   :  { %v1573_v50 = vsel %vm111_vm2, %v1562_v40, 0.0 }
 0xb49   :  { %v1475_v15 = vpop.f32.mrf.mxu3  ;;  %v1533_v16 = vpop.f32.mrf.mxu1 }
 0xb4a   :  { %v1568_v18 = vsel %vm111_vm2, %v1475_v15, 0.0  ;;  %v1571_v19 = vsel %vm111_vm2, %v1533_v16, 0.0 }
 0xb4b   :  { %v1570_v47 = vadd.f32 %v1569_v17, %v1568_v18 }
 0xb4d   :  { %v1572_v20 = vadd.f32 %v1571_v19, %v1570_v47 }
 0xb4f   :  { %v1574_v21 = vadd.f32 %v1573_v50, %v1572_v20 }
 0xb51   :  { %v1584_v22 = vadd.f32 %v1982_v46, %v1574_v21  ;;  %v1478_v56 = vpop.f32.mrf.mxu3 }
 0xb52   :  { %v1575_v28 = vsel %vm111_vm2, %v1478_v56, 0.0  ;;  %v1985_v56 = vld [vmem:[#allocation5 + $0x2b8] ss:$0 sm:$0xff] }
 0xb53   :  { %v1586_v24 = vadd.f32 %v1584_v22, %v2380_v3 }
 0xb55   :  { %v1590_v25 = vsel %vm111_vm2, %v1586_v24, 0.0 }
 0xb56   :  { %1591 = vadd.xlane.f32.xlu0 %v1590_v25  ;;  %v1678_v25 = vld [vmem:[#allocation5 + $0x2c8] sm:$0xff] }
 0xb58   :  { %v1507_v27 = vpop.f32.mrf.mxu0 }
 0xb59   :  { %v1576_v63 = vsel %vm111_vm2, %v1507_v27, 0.0  ;;  %v1677_v27 = vld [vmem:[#allocation5 + $0x2c0] sm:$0xff] }
 0xb5a   :  { %v1577_v30 = vadd.f32 %v1576_v63, %v1575_v28 }
 0xb5c   :  { %v1565_v23 = vpop.f32.mrf.mxu2 }
 0xb5d   :  { %v1580_v36 = vsel %vm111_vm2, %v1565_v23, 0.0 }
 0xb60   :  { %v1536_v31 = vpop.f32.mrf.mxu1 }
 0xb61   :  { %v1578_v32 = vsel %vm111_vm2, %v1536_v31, 0.0 }
 0xb62   :  { %v1579_v33 = vadd.f32 %v1578_v32, %v1577_v30 }
 0xb64   :  { %v1581_v38 = vadd.f32 %v1580_v36, %v1579_v33  ;;  %v1986_v33 = vld [vmem:[#allocation5 + $0x300] ss:$0 sm:$0xff] }
 0xb66   :  { %v1585_v39 = vadd.f32 %v1982_v46, %v1581_v38 }
 0xb68   :  { %v1587_v3 = vadd.f32 %v1585_v39, %v2392_v37  ;;  %v1643_v37 = vld [vmem:[#allocation5 + $0x2b0] sm:$0xff] }
 0xb69   :  { %1664 = vmatpush.msrb.mxu3 %v1643_v37 }
 0xb6a   :  { %v1593_v35 = vsel %vm111_vm2, %v1587_v3, 0.0 }
 0xb6b   :  { %1594 = vadd.xlane.f32.xlu2 %v1593_v35  ;;  %1665 = vmatpush.msrb.mxu3 %v1642_v29 }
 0xb6d   :  { %1666 = vmatpush.msrb.mxu3 %v1641_v34 }
 0xb6f   :  { %1667 = vmatpush.msrb.mxu3 %v1640_v57  ;;  %v1773_v57 = vld [vmem:[#allocation5 + $0x340] sm:$0xff] }
 0xb70   :  { %1794 = vmatpush.msrb.mxu1 %v1773_v57 }
 0xbc9   :  { %v1592_v60 = vpop.xlane.xlu0 %1591 }
 0xbca   :  { %v1596_v41 = vmul.f32 %v1592_v60, %v2357_v42 }
 0xbcc   :  { %v1598_v44 = vsub.f32 %v1586_v24, %v1596_v41  ;;  %v1679_v24 = vld [vmem:[#allocation5 + $0x2d0] sm:$0xff] }
 0xbcd   :  { %1706 = vmatpush.msrb.mxu0 %v1679_v24 }
 0xbce   :  { %v1600_v26 = vmul.f32 %v1598_v44, %v1598_v44 }
 0xbcf   :  { %1707 = vmatpush.msrb.mxu0 %v1678_v25 }
 0xbd0   :  { %v1602_v48 = vsel %vm111_vm2, %v1600_v26, 0.0 }
 0xbd1   :  { %1603 = vadd.xlane.f32.xlu2 %v1602_v48  ;;  %1708 = vmatpush.msrb.mxu0 %v1677_v27 }
 0xbde   :  { %v1595_v49 = vpop.xlane.xlu2 %1594 }
 0xbdf   :  { %v1597_v1 = vmul.f32 %v1595_v49, %v2357_v42 }
 0xbe1   :  { %v1599_v51 = vsub.f32 %v1587_v3, %v1597_v1 }
 0xbe3   :  { %v1601_v52 = vmul.f32 %v1599_v51, %v1599_v51 }
 0xbe5   :  { %v1605_v54 = vsel %vm111_vm2, %v1601_v52, 0.0 }
 0xbe6   :  { %1606 = vadd.xlane.f32.xlu2 %v1605_v54 }
 0xc44   :  { %v1604_v53 = vpop.xlane.xlu2 %1603 }
 0xc45   :  { %v1608_v58 = vmul.f32 %v1604_v53, %v2357_v42  ;;  %v1772_v53 = vld [vmem:[#allocation5 + $0x338] sm:$0xff] }
 0xc46   :  { %1795 = vmatpush.msrb.mxu1 %v1772_v53 }
 0xc47   :  { %v1610_v45 = vadd.f32 1e-05, %v1608_v58  ;;  %v1771_v58 = vld [vmem:[#allocation5 + $0x330] sm:$0xff] }
 0xc48   :  { %1796 = vmatpush.msrb.mxu1 %v1771_v58 }
 0xc49   :  { %2064 = vrsqrt.f32 %v1610_v45  ;;  %vm1618_vm6 = vweird.f32 %v1610_v45 }
 0xc4f   :  { %v2065_v59 = vpop.eup %2064 }
 0xc50   :  { %v1613_v43 = vmul.f32 %v2065_v59, %v1610_v45  ;;  %vm1619_vm3 = vweird.f32 %v2065_v59  ;;  %v1770_v45 = vld [vmem:[#allocation5 + $0x328] sm:$0xff] }
 0xc51   :  { %vm1620_vm7 = vmor %vm1618_vm6, %vm1619_vm3  ;;  %1797 = vmatpush.msrb.mxu1 %v1770_v45 }
 0xc52   :  { %v1614_v55 = vmul.f32 %v2065_v59, %v1613_v43 }
 0xc54   :  { %v1615_v61 = vmul.f32 0.5, %v1614_v55 }
 0xc56   :  { %v1616_v62 = vsub.f32 1.5, %v1615_v61 }
 0xc58   :  { %v1617_v4 = vmul.f32 %v2065_v59, %v1616_v62 }
 0xc59   :  { %v1607_v7 = vpop.xlane.xlu2 %1606 }
 0xc5a   :  { %v1621_v8 = vsel %vm1620_vm7, %v2065_v59, %v1617_v4  ;;  %v1609_v9 = vmul.f32 %v1607_v7, %v2357_v42 }
 0xc5b   :  { %v1632_v11 = vmul.f32 %v1621_v8, %v1598_v44 }
 0xc5c   :  { %v1611_v13 = vadd.f32 1e-05, %v1609_v9 }
 0xc5d   :  { %v1635_v15 = vmul.f32 %v1983_v6, %v1632_v11  ;;  %v1988_v11 = vld [vmem:[#allocation5 + $0x320] ss:$0 sm:$0xff] }
 0xc5e   :  { %2066 = vrsqrt.f32 %v1611_v13  ;;  %vm1628_vm9 = vweird.f32 %v1611_v13 }
 0xc5f   :  { %v1638_v16 = vadd.f32 %v1984_v12, %v1635_v15 }
 0xc61   :  { %1914 = vmatmul.msk.f32.vlgmr.msrb.gmra.mxu3 %vm111_vm2, %v1638_v16 }
 0xc64   :  { %v2067_v17 = vpop.eup %2066 }
 0xc65   :  { %v1623_v18 = vmul.f32 %v2067_v17, %v1611_v13  ;;  %vm1629_vm8 = vweird.f32 %v2067_v17 }
 0xc66   :  { %vm1630_vm10 = vmor %vm1628_vm9, %vm1629_vm8 }
 0xc67   :  { %v1624_v19 = vmul.f32 %v2067_v17, %v1623_v18 }
 0xc69   :  { %v1625_v40 = vmul.f32 0.5, %v1624_v19 }
 0xc6b   :  { %v1626_v47 = vsub.f32 1.5, %v1625_v40 }
 0xc6d   :  { %v1627_v20 = vmul.f32 %v2067_v17, %v1626_v47 }
 0xc6f   :  { %v1631_v46 = vsel %vm1630_vm10, %v2067_v17, %v1627_v20 }
 0xc70   :  { %v1633_v50 = vmul.f32 %v1631_v46, %v1599_v51 }
 0xc72   :  { %v1636_v21 = vmul.f32 %v1983_v6, %v1633_v50  ;;  %v1987_v6 = vld [vmem:[#allocation5 + $0x318] ss:$0 sm:$0xff]  ;;  %v1989_v50 = vld [vmem:[#allocation5 + $0x348] ss:$0 sm:$0xff] }
 0xc74   :  { %v1639_v22 = vadd.f32 %v1984_v12, %v1636_v21 }
 0xc76   :  { %1915 = vmatmul.msk.f32.gmra.mxu3 %vm111_vm2, %v1639_v22 }
 0xce4   :  { %v1669_v63 = vpop.f32.mrf.mxu3 }
 0xce5   :  { %v1670_v28 = vadd.f32 %v1985_v56, %v1669_v63 }
 0xce7   :  { %v1675_v30 = vmax.f32 %v1670_v28, 0.0 }
 0xce9   :  { %1916 = vmatmul.msk.f32.vlgmr.msrb.gmra.mxu0 %vm850_vm12, %v1675_v30 }
 0xcf9   :  { %v1672_v23 = vpop.f32.mrf.mxu3 }
 0xcfa   :  { %v1673_v31 = vadd.f32 %v1985_v56, %v1672_v23 }
 0xcfc   :  { %v1676_v32 = vmax.f32 %v1673_v31, 0.0 }
 0xcfe   :  { %1917 = vmatmul.msk.f32.gmra.mxu0 %vm850_vm12, %v1676_v32 }
 0xd66   :  { %v1710_v36 = vpop.f32.mrf.mxu0 }
 0xd67   :  { %v1711_v38 = vadd.f32 %v1986_v33, %v1710_v36 }
 0xd69   :  { %v1716_v39 = vadd.f32 %v1711_v38, %v1638_v16 }
 0xd6b   :  { %v1720_v3 = vsel %vm111_vm2, %v1716_v39, 0.0 }
 0xd6c   :  { %1721 = vadd.xlane.f32.xlu1 %v1720_v3 }
 0xd7b   :  { %v1713_v35 = vpop.f32.mrf.mxu0 }
 0xd7c   :  { %v1714_v60 = vadd.f32 %v1986_v33, %v1713_v35 }
 0xd7e   :  { %v1717_v41 = vadd.f32 %v1714_v60, %v1639_v22 }
 0xd80   :  { %v1723_v44 = vsel %vm111_vm2, %v1717_v41, 0.0 }
 0xd81   :  { %1724 = vadd.xlane.f32.xlu2 %v1723_v44 }
 0xddf   :  { %v1722_v26 = vpop.xlane.xlu1 %1721 }
 0xde0   :  { %v1726_v48 = vmul.f32 %v1722_v26, %v2357_v42 }
 0xde2   :  { %v1728_v49 = vsub.f32 %v1716_v39, %v1726_v48 }
 0xde4   :  { %v1730_v1 = vmul.f32 %v1728_v49, %v1728_v49 }
 0xde6   :  { %v1732_v51 = vsel %vm111_vm2, %v1730_v1, 0.0 }
 0xde7   :  { %1733 = vadd.xlane.f32.xlu1 %v1732_v51 }
 0xdf4   :  { %v1725_v52 = vpop.xlane.xlu2 %1724 }
 0xdf5   :  { %v1727_v54 = vmul.f32 %v1725_v52, %v2357_v42 }
 0xdf7   :  { %v1729_v37 = vsub.f32 %v1717_v41, %v1727_v54 }
 0xdf9   :  { %v1731_v29 = vmul.f32 %v1729_v37, %v1729_v37 }
 0xdfb   :  { %v1735_v34 = vsel %vm111_vm2, %v1731_v29, 0.0 }
 0xdfc   :  { %1736 = vadd.xlane.f32.xlu2 %v1735_v34 }
 0xe5a   :  { %v1734_v59 = vpop.xlane.xlu1 %1733 }
 0xe5b   :  { %v1738_v43 = vmul.f32 %v1734_v59, %v2357_v42 }
 0xe5d   :  { %v1740_v55 = vadd.f32 1e-05, %v1738_v43 }
 0xe5f   :  { %2068 = vrsqrt.f32 %v1740_v55  ;;  %vm1748_vm12 = vweird.f32 %v1740_v55 }
 0xe65   :  { %v2069_v61 = vpop.eup %2068 }
 0xe66   :  { %v1743_v62 = vmul.f32 %v2069_v61, %v1740_v55  ;;  %vm1749_vm11 = vweird.f32 %v2069_v61 }
 0xe67   :  { %vm1750_vm13 = vmor %vm1748_vm12, %vm1749_vm11 }
 0xe68   :  { %v1744_v0 = vmul.f32 %v2069_v61, %v1743_v62 }
 0xe6a   :  { %v1745_v2 = vmul.f32 0.5, %v1744_v0 }
 0xe6c   :  { %v1746_v4 = vsub.f32 1.5, %v1745_v2 }
 0xe6e   :  { %v1747_v5 = vmul.f32 %v2069_v61, %v1746_v4 }
 0xe6f   :  { %v1737_v7 = vpop.xlane.xlu2 %1736 }
 0xe70   :  { %v1751_v8 = vsel %vm1750_vm13, %v2069_v61, %v1747_v5  ;;  %v1739_v9 = vmul.f32 %v1737_v7, %v2357_v42 }
 0xe71   :  { %v1762_v10 = vmul.f32 %v1751_v8, %v1728_v49 }
 0xe72   :  { %v1741_v12 = vadd.f32 1e-05, %v1739_v9 }
 0xe73   :  { %v1765_v13 = vmul.f32 %v1987_v6, %v1762_v10 }
 0xe74   :  { %2070 = vrsqrt.f32 %v1741_v12  ;;  %vm1758_vm15 = vweird.f32 %v1741_v12 }
 0xe75   :  { %v1768_v14 = vadd.f32 %v1988_v11, %v1765_v13 }
 0xe77   :  { %1918 = vmatmul.msk.f32.vlgmr.msrb.gmra.mxu1 %vm111_vm2, %v1768_v14 }
 0xe7a   :  { %v2071_v15 = vpop.eup %2070 }
 0xe7b   :  { %v1753_v16 = vmul.f32 %v2071_v15, %v1741_v12  ;;  %vm1759_vm14 = vweird.f32 %v2071_v15 }
 0xe7c   :  { %vm1760_vm0 = vmor %vm1758_vm15, %vm1759_vm14 }
 0xe7d   :  { %v1754_v17 = vmul.f32 %v2071_v15, %v1753_v16 }
 0xe7f   :  { %v1755_v18 = vmul.f32 0.5, %v1754_v17 }
 0xe81   :  { %v1756_v19 = vsub.f32 1.5, %v1755_v18 }
 0xe83   :  { %v1757_v40 = vmul.f32 %v2071_v15, %v1756_v19 }
 0xe85   :  { %v1761_v47 = vsel %vm1760_vm0, %v2071_v15, %v1757_v40 }
 0xe86   :  { %v1763_v20 = vmul.f32 %v1761_v47, %v1729_v37 }
 0xe88   :  { %v1766_v42 = vmul.f32 %v1987_v6, %v1763_v20 }
 0xe8a   :  { %v1769_v46 = vadd.f32 %v1988_v11, %v1766_v42 }
 0xe8c   :  { %1919 = vmatmul.msk.f32.gmra.mxu1 %vm111_vm2, %v1769_v46 }
 0xef4   :  { %v1799_v21 = vpop.f32.mrf.mxu1 }
 0xef5   :  { %v1800_v22 = vadd.f32 %v1989_v50, %v1799_v21 }
 0xef7   :  { %1805 = vst.msk [vmem:[#allocation7] sm:$0xff] %vm375_vm4, %v1800_v22 }
 0xf09   :  { %v1802_v24 = vpop.f32.mrf.mxu1 }
 0xf0a   :  { %v1803_v25 = vadd.f32 %v1989_v50, %v1802_v24 }
 0xf0c   :  { %1806 = vst.msk [vmem:[#allocation7 + $0x8] sm:$0xff] %vm375_vm4, %v1803_v25 }
 0xf0d   :  { %1819 = dma.vmem_to_hbm [thread:$0]  %s1812_s22, 256, %s1814_s25, [#allocation4], %s2151_s17, %s2151_s17, %s2152_s18  }
 0xf0e   :  { %2148 = dma.done.wait [#allocation4], 256  }
 0xf0f   :  { %2149 = vsyncadd [#allocation4], 4294967040 }
 0xf10   :  { %1824 = vsyncpa [#allocation3], 1 }
 0xf11   :  { %1825 = vsyncpa [#allocation6], 1 }
 0xf12   :  { %1826 = vsyncpa [#allocation4], 1 }

</bundles_post_ra>
